<compile_context>
chip_gen: v6e
topology: v6e:2x2x1
jax: 0.10.0
libtpu: 0.0.40
codegen_flags: <defaults>
</compile_context>

<pallas_src>
import jax
import jax.numpy as jnp
from jax import lax
from jax.experimental import pallas as pl
from jax.experimental.pallas import tpu as pltpu

INPUT_SIZE = 11
HIDDEN = 128
OUTPUT = 10
IN_PAD = 16     # padded input-feature dim (next multiple of 8 >= 11)
OUT_PAD = 128   # padded output dim (lane-dense output store)


def lstm_kernel(x_ref, wih_ref, whh_ref, b_ref, wlin_ref, blin_ref, out_ref,
                xp_scr):
    """Single-layer LSTM (batch=1) + final Linear on the last hidden state.

    x_ref   : (T, IN_PAD)   f32  input sequence (zero-padded features)
    wih_ref : (IN_PAD, 4H)  f32  W_ih^T (zero-padded rows)
    whh_ref : (H, 4H)       bf16 W_hh^T
    b_ref   : (1, 4H)       f32  b_ih + b_hh
    wlin_ref: (H, OUT_PAD)  f32  W_linear^T (zero-padded cols)
    blin_ref: (1, OUT_PAD)  f32  b_linear (zero-padded)
    out_ref : (1, OUT_PAD)  f32  prediction at the last timestep
    xp_scr  : (T, 4H)       f32  batched input projections (off the recurrent
                                 dependence chain)
    """
    T = x_ref.shape[0]
    H = HIDDEN

    # Input projection for all timesteps at once: (T, 4H) = x @ W_ih^T + bias.
    xp_scr[...] = (
        jnp.dot(x_ref[...], wih_ref[...], preferred_element_type=jnp.float32)
        + b_ref[...]
    )

    def step(t, carry):
        h, c = carry
        # Recurrent projection on the MXU: (1, H) @ (H, 4H) -> (1, 4H).
        gates = xp_scr[pl.ds(t, 1), :] + jnp.dot(
            h.astype(jnp.bfloat16), whh_ref[...],
            preferred_element_type=jnp.float32,
        )
        # PyTorch gate order: i, f, g, o.
        i_g = jax.nn.sigmoid(gates[:, 0 * H:1 * H])
        f_g = jax.nn.sigmoid(gates[:, 1 * H:2 * H])
        g_g = jnp.tanh(gates[:, 2 * H:3 * H])
        o_g = jax.nn.sigmoid(gates[:, 3 * H:4 * H])
        c_new = f_g * c + i_g * g_g
        h_new = o_g * jnp.tanh(c_new)
        return h_new, c_new

    # h / c live in vregs as loop carries (no VMEM round-trip per step).
    h0 = jnp.zeros((1, H), jnp.float32)
    c0 = jnp.zeros((1, H), jnp.float32)
    unroll = True if T <= 64 else 8  # full unroll for short sequences
    h_last, _ = lax.fori_loop(0, T, step, (h0, c0), unroll=unroll)

    # Final linear layer on the last hidden state: predictions[-1].
    out_ref[...] = (
        jnp.dot(h_last, wlin_ref[...], preferred_element_type=jnp.float32)
        + blin_ref[...]
    )


def prepare_params(w_ih, w_hh, b_ih, b_hh, w_lin, b_lin):
    """One-time weight prep (transpose / pad / cast). Call once, reuse forever."""
    wih_t = jnp.zeros((IN_PAD, 4 * HIDDEN), jnp.float32).at[:INPUT_SIZE, :].set(
        w_ih.T.astype(jnp.float32))
    whh_t = w_hh.T.astype(jnp.bfloat16)                            # (H, 4H)
    bias = (b_ih + b_hh).reshape(1, 4 * HIDDEN).astype(jnp.float32)
    wlin_t = jnp.zeros((HIDDEN, OUT_PAD), jnp.float32).at[:, :OUTPUT].set(
        w_lin.T.astype(jnp.float32))
    blin_p = jnp.zeros((1, OUT_PAD), jnp.float32).at[0, :OUTPUT].set(
        b_lin.astype(jnp.float32))
    return wih_t, whh_t, bias, wlin_t, blin_p


@jax.jit
def my_lstm_forward(x, params):
    """x: (T, INPUT_SIZE) float32; params from prepare_params(). -> (OUTPUT,)."""
    wih_t, whh_t, bias, wlin_t, blin_p = params
    T = x.shape[0]
    x_pad = jnp.zeros((T, IN_PAD), jnp.float32).at[:, :INPUT_SIZE].set(x)

    # TODO(synk): for very long T, chunk the time axis with a grid /
    # pltpu.emit_pipeline so x and xp_scr stream through VMEM (matters most on
    # v7x's 64 MiB VMEM); at small T a single resident call is fastest.
    out = pl.pallas_call(
        lstm_kernel,
        out_shape=jax.ShapeDtypeStruct((1, OUT_PAD), jnp.float32),
        in_specs=[pl.BlockSpec(memory_space=pltpu.MemorySpace.VMEM)] * 6,
        out_specs=pl.BlockSpec(memory_space=pltpu.MemorySpace.VMEM),
        scratch_shapes=[
            pltpu.VMEM((T, 4 * HIDDEN), jnp.float32),   # input projections
        ],
    )(x_pad, wih_t, whh_t, bias, wlin_t, blin_p)
    return out[0, :OUTPUT]


def _reference(x, w_ih, w_hh, b_ih, b_hh, w_lin, b_lin):
    """Pure-JAX f32 reference matching torch.nn.LSTM + Linear semantics."""
    H = HIDDEN
    h = jnp.zeros((1, H), jnp.float32)
    c = jnp.zeros((1, H), jnp.float32)
    for t in range(x.shape[0]):
        gates = x[t:t + 1] @ w_ih.T + h @ w_hh.T + b_ih + b_hh
        i = jax.nn.sigmoid(gates[:, 0 * H:1 * H])
        f = jax.nn.sigmoid(gates[:, 1 * H:2 * H])
        g = jnp.tanh(gates[:, 2 * H:3 * H])
        o = jax.nn.sigmoid(gates[:, 3 * H:4 * H])
        c = f * c + i * g
        h = o * jnp.tanh(c)
    return (h @ w_lin.T + b_lin)[0]


if __name__ == "__main__":
    T = 8  # sequence length
    key = jax.random.PRNGKey(0)
    ks = jax.random.split(key, 7)
    scale = 1.0 / jnp.sqrt(HIDDEN)
    x = jax.random.normal(ks[0], (T, INPUT_SIZE), jnp.float32)
    w_ih = jax.random.uniform(ks[1], (4 * HIDDEN, INPUT_SIZE), jnp.float32, -scale, scale)
    w_hh = jax.random.uniform(ks[2], (4 * HIDDEN, HIDDEN), jnp.float32, -scale, scale)
    b_ih = jax.random.uniform(ks[3], (4 * HIDDEN,), jnp.float32, -scale, scale)
    b_hh = jax.random.uniform(ks[4], (4 * HIDDEN,), jnp.float32, -scale, scale)
    w_lin = jax.random.uniform(ks[5], (OUTPUT, HIDDEN), jnp.float32, -scale, scale)
    b_lin = jax.random.uniform(ks[6], (OUTPUT,), jnp.float32, -scale, scale)

    params = prepare_params(w_ih, w_hh, b_ih, b_hh, w_lin, b_lin)  # hoisted, one-time
    pred = my_lstm_forward(x, params)
    pred = jax.block_until_ready(pred)
    assert pred.shape == (OUTPUT,)

    ref = _reference(x, w_ih, w_hh, b_ih, b_hh, w_lin, b_lin)
    # Tolerance relaxed vs. pure-f32 because W_hh is held in bf16 (f32 accum).
    assert jnp.allclose(pred, ref, atol=2e-2, rtol=2e-2), (pred, ref)

    print("KERNEL_OK")
</pallas_src>

<mosaic_0001>
module attributes {stable_mosaic.version = 11 : i64} {
  func.func @lstm_kernel(%arg0: memref<8x16xf32, #tpu.memory_space<vmem>>, %arg1: memref<16x512xf32, #tpu.memory_space<vmem>>, %arg2: memref<128x512xbf16, #tpu.memory_space<vmem>>, %arg3: memref<1x512xf32, #tpu.memory_space<vmem>>, %arg4: memref<128x128xf32, #tpu.memory_space<vmem>>, %arg5: memref<1x128xf32, #tpu.memory_space<vmem>>, %arg6: memref<1x128xf32, #tpu.memory_space<vmem>>, %arg7: memref<8x512xf32, #tpu.memory_space<vmem>>) attributes {dimension_semantics = [], scalar_prefetch = 0 : i64, scratch_operands = 1 : i64, tpu.core_type = #tpu.core_type<tc>} {
    %c0 = arith.constant 0 : index
    %c0_0 = arith.constant 0 : index
    %0 = vector.load %arg0[%c0, %c0_0] : memref<8x16xf32, #tpu.memory_space<vmem>>, vector<8x16xf32>
    %c0_1 = arith.constant 0 : index
    %c0_2 = arith.constant 0 : index
    %1 = vector.load %arg1[%c0_1, %c0_2] : memref<16x512xf32, #tpu.memory_space<vmem>>, vector<16x512xf32>
    %cst = arith.constant dense<0.000000e+00> : vector<8x512xf32>
    %2 = tpu.matmul %0, %1, %cst {dimension_numbers = #tpu.dot_dimension_numbers<[1], [0], [0], [1], [0, 0, 1, 1], [], []>} : vector<8x16xf32>, vector<16x512xf32>, vector<8x512xf32> -> vector<8x512xf32>
    %c0_3 = arith.constant 0 : index
    %c0_4 = arith.constant 0 : index
    %3 = vector.load %arg3[%c0_3, %c0_4] : memref<1x512xf32, #tpu.memory_space<vmem>>, vector<1x512xf32>
    %4 = vector.broadcast %3 : vector<1x512xf32> to vector<8x512xf32>
    %5 = arith.addf %2, %4 : vector<8x512xf32>
    %c0_5 = arith.constant 0 : index
    %c0_6 = arith.constant 0 : index
    %6 = vector.load %arg7[%c0_5, %c0_6] : memref<8x512xf32, #tpu.memory_space<vmem>>, vector<8x512xf32>
    tpu.vector_store %arg7[%c0_5, %c0_6], %5 {strides = array<i32>} : memref<8x512xf32, #tpu.memory_space<vmem>>, vector<8x512xf32>,
    %cst_7 = arith.constant 0.000000e+00 : f32
    %7 = vector.broadcast %cst_7 : f32 to vector<1x128xf32>
    %cst_8 = arith.constant 0.000000e+00 : f32
    %8 = vector.broadcast %cst_8 : f32 to vector<1x128xf32>
    %c0_i32 = arith.constant 0 : i32
    %9 = arith.index_cast %c0_i32 : i32 to index
    %c0_9 = arith.constant 0 : index
    %10 = vector.load %arg7[%9, %c0_9] : memref<8x512xf32, #tpu.memory_space<vmem>>, vector<1x512xf32>
    %11 = arith.truncf %7 : vector<1x128xf32> to vector<1x128xbf16>
    %c0_10 = arith.constant 0 : index
    %c0_11 = arith.constant 0 : index
    %12 = vector.load %arg2[%c0_10, %c0_11] : memref<128x512xbf16, #tpu.memory_space<vmem>>, vector<128x512xbf16>
    %cst_12 = arith.constant dense<0.000000e+00> : vector<1x512xf32>
    %13 = tpu.matmul %11, %12, %cst_12 {dimension_numbers = #tpu.dot_dimension_numbers<[1], [0], [0], [1], [0, 0, 1, 1], [], []>} : vector<1x128xbf16>, vector<128x512xbf16>, vector<1x512xf32> -> vector<1x512xf32>
    %14 = arith.addf %10, %13 : vector<1x512xf32>
    %15 = vector.extract_strided_slice %14 {offsets = [0, 0], sizes = [1, 128], strides = [1, 1]} : vector<1x512xf32> to vector<1x128xf32>
    %16 = arith.negf %15 : vector<1x128xf32>
    %17 = math.exp %16 : vector<1x128xf32>
    %cst_13 = arith.constant 1.000000e+00 : f32
    %18 = vector.broadcast %cst_13 : f32 to vector<1x128xf32>
    %19 = arith.addf %18, %17 : vector<1x128xf32>
    %20 = arith.divf %18, %19 : vector<1x128xf32>
    %21 = vector.extract_strided_slice %14 {offsets = [0, 128], sizes = [1, 128], strides = [1, 1]} : vector<1x512xf32> to vector<1x128xf32>
    %22 = arith.negf %21 : vector<1x128xf32>
    %23 = math.exp %22 : vector<1x128xf32>
    %cst_14 = arith.constant 1.000000e+00 : f32
    %24 = vector.broadcast %cst_14 : f32 to vector<1x128xf32>
    %25 = arith.addf %24, %23 : vector<1x128xf32>
    %26 = arith.divf %24, %25 : vector<1x128xf32>
    %27 = vector.extract_strided_slice %14 {offsets = [0, 256], sizes = [1, 128], strides = [1, 1]} : vector<1x512xf32> to vector<1x128xf32>
    %28 = math.tanh %27 : vector<1x128xf32>
    %29 = vector.extract_strided_slice %14 {offsets = [0, 384], sizes = [1, 128], strides = [1, 1]} : vector<1x512xf32> to vector<1x128xf32>
    %30 = arith.negf %29 : vector<1x128xf32>
    %31 = math.exp %30 : vector<1x128xf32>
    %cst_15 = arith.constant 1.000000e+00 : f32
    %32 = vector.broadcast %cst_15 : f32 to vector<1x128xf32>
    %33 = arith.addf %32, %31 : vector<1x128xf32>
    %34 = arith.divf %32, %33 : vector<1x128xf32>
    %35 = arith.mulf %26, %8 : vector<1x128xf32>
    %36 = arith.mulf %20, %28 : vector<1x128xf32>
    %37 = arith.addf %35, %36 : vector<1x128xf32>
    %38 = math.tanh %37 : vector<1x128xf32>
    %39 = arith.mulf %34, %38 : vector<1x128xf32>
    %c1_i32 = arith.constant 1 : i32
    %40 = arith.index_cast %c1_i32 : i32 to index
    %c0_16 = arith.constant 0 : index
    %41 = vector.load %arg7[%40, %c0_16] : memref<8x512xf32, #tpu.memory_space<vmem>>, vector<1x512xf32>
    %42 = arith.truncf %39 : vector<1x128xf32> to vector<1x128xbf16>
    %c0_17 = arith.constant 0 : index
    %c0_18 = arith.constant 0 : index
    %43 = vector.load %arg2[%c0_17, %c0_18] : memref<128x512xbf16, #tpu.memory_space<vmem>>, vector<128x512xbf16>
    %cst_19 = arith.constant dense<0.000000e+00> : vector<1x512xf32>
    %44 = tpu.matmul %42, %43, %cst_19 {dimension_numbers = #tpu.dot_dimension_numbers<[1], [0], [0], [1], [0, 0, 1, 1], [], []>} : vector<1x128xbf16>, vector<128x512xbf16>, vector<1x512xf32> -> vector<1x512xf32>
    %45 = arith.addf %41, %44 : vector<1x512xf32>
    %46 = vector.extract_strided_slice %45 {offsets = [0, 0], sizes = [1, 128], strides = [1, 1]} : vector<1x512xf32> to vector<1x128xf32>
    %47 = arith.negf %46 : vector<1x128xf32>
    %48 = math.exp %47 : vector<1x128xf32>
    %cst_20 = arith.constant 1.000000e+00 : f32
    %49 = vector.broadcast %cst_20 : f32 to vector<1x128xf32>
    %50 = arith.addf %49, %48 : vector<1x128xf32>
    %51 = arith.divf %49, %50 : vector<1x128xf32>
    %52 = vector.extract_strided_slice %45 {offsets = [0, 128], sizes = [1, 128], strides = [1, 1]} : vector<1x512xf32> to vector<1x128xf32>
    %53 = arith.negf %52 : vector<1x128xf32>
    %54 = math.exp %53 : vector<1x128xf32>
    %cst_21 = arith.constant 1.000000e+00 : f32
    %55 = vector.broadcast %cst_21 : f32 to vector<1x128xf32>
    %56 = arith.addf %55, %54 : vector<1x128xf32>
    %57 = arith.divf %55, %56 : vector<1x128xf32>
    %58 = vector.extract_strided_slice %45 {offsets = [0, 256], sizes = [1, 128], strides = [1, 1]} : vector<1x512xf32> to vector<1x128xf32>
    %59 = math.tanh %58 : vector<1x128xf32>
    %60 = vector.extract_strided_slice %45 {offsets = [0, 384], sizes = [1, 128], strides = [1, 1]} : vector<1x512xf32> to vector<1x128xf32>
    %61 = arith.negf %60 : vector<1x128xf32>
    %62 = math.exp %61 : vector<1x128xf32>
    %cst_22 = arith.constant 1.000000e+00 : f32
    %63 = vector.broadcast %cst_22 : f32 to vector<1x128xf32>
    %64 = arith.addf %63, %62 : vector<1x128xf32>
    %65 = arith.divf %63, %64 : vector<1x128xf32>
    %66 = arith.mulf %57, %37 : vector<1x128xf32>
    %67 = arith.mulf %51, %59 : vector<1x128xf32>
    %68 = arith.addf %66, %67 : vector<1x128xf32>
    %69 = math.tanh %68 : vector<1x128xf32>
    %70 = arith.mulf %65, %69 : vector<1x128xf32>
    %c2_i32 = arith.constant 2 : i32
    %71 = arith.index_cast %c2_i32 : i32 to index
    %c0_23 = arith.constant 0 : index
    %72 = vector.load %arg7[%71, %c0_23] : memref<8x512xf32, #tpu.memory_space<vmem>>, vector<1x512xf32>
    %73 = arith.truncf %70 : vector<1x128xf32> to vector<1x128xbf16>
    %c0_24 = arith.constant 0 : index
    %c0_25 = arith.constant 0 : index
    %74 = vector.load %arg2[%c0_24, %c0_25] : memref<128x512xbf16, #tpu.memory_space<vmem>>, vector<128x512xbf16>
    %cst_26 = arith.constant dense<0.000000e+00> : vector<1x512xf32>
    %75 = tpu.matmul %73, %74, %cst_26 {dimension_numbers = #tpu.dot_dimension_numbers<[1], [0], [0], [1], [0, 0, 1, 1], [], []>} : vector<1x128xbf16>, vector<128x512xbf16>, vector<1x512xf32> -> vector<1x512xf32>
    %76 = arith.addf %72, %75 : vector<1x512xf32>
    %77 = vector.extract_strided_slice %76 {offsets = [0, 0], sizes = [1, 128], strides = [1, 1]} : vector<1x512xf32> to vector<1x128xf32>
    %78 = arith.negf %77 : vector<1x128xf32>
    %79 = math.exp %78 : vector<1x128xf32>
    %cst_27 = arith.constant 1.000000e+00 : f32
    %80 = vector.broadcast %cst_27 : f32 to vector<1x128xf32>
    %81 = arith.addf %80, %79 : vector<1x128xf32>
    %82 = arith.divf %80, %81 : vector<1x128xf32>
    %83 = vector.extract_strided_slice %76 {offsets = [0, 128], sizes = [1, 128], strides = [1, 1]} : vector<1x512xf32> to vector<1x128xf32>
    %84 = arith.negf %83 : vector<1x128xf32>
    %85 = math.exp %84 : vector<1x128xf32>
    %cst_28 = arith.constant 1.000000e+00 : f32
    %86 = vector.broadcast %cst_28 : f32 to vector<1x128xf32>
    %87 = arith.addf %86, %85 : vector<1x128xf32>
    %88 = arith.divf %86, %87 : vector<1x128xf32>
    %89 = vector.extract_strided_slice %76 {offsets = [0, 256], sizes = [1, 128], strides = [1, 1]} : vector<1x512xf32> to vector<1x128xf32>
    %90 = math.tanh %89 : vector<1x128xf32>
    %91 = vector.extract_strided_slice %76 {offsets = [0, 384], sizes = [1, 128], strides = [1, 1]} : vector<1x512xf32> to vector<1x128xf32>
    %92 = arith.negf %91 : vector<1x128xf32>
    %93 = math.exp %92 : vector<1x128xf32>
    %cst_29 = arith.constant 1.000000e+00 : f32
    %94 = vector.broadcast %cst_29 : f32 to vector<1x128xf32>
    %95 = arith.addf %94, %93 : vector<1x128xf32>
    %96 = arith.divf %94, %95 : vector<1x128xf32>
    %97 = arith.mulf %88, %68 : vector<1x128xf32>
    %98 = arith.mulf %82, %90 : vector<1x128xf32>
    %99 = arith.addf %97, %98 : vector<1x128xf32>
    %100 = math.tanh %99 : vector<1x128xf32>
    %101 = arith.mulf %96, %100 : vector<1x128xf32>
    %c3_i32 = arith.constant 3 : i32
    %102 = arith.index_cast %c3_i32 : i32 to index
    %c0_30 = arith.constant 0 : index
    %103 = vector.load %arg7[%102, %c0_30] : memref<8x512xf32, #tpu.memory_space<vmem>>, vector<1x512xf32>
    %104 = arith.truncf %101 : vector<1x128xf32> to vector<1x128xbf16>
    %c0_31 = arith.constant 0 : index
    %c0_32 = arith.constant 0 : index
    %105 = vector.load %arg2[%c0_31, %c0_32] : memref<128x512xbf16, #tpu.memory_space<vmem>>, vector<128x512xbf16>
    %cst_33 = arith.constant dense<0.000000e+00> : vector<1x512xf32>
    %106 = tpu.matmul %104, %105, %cst_33 {dimension_numbers = #tpu.dot_dimension_numbers<[1], [0], [0], [1], [0, 0, 1, 1], [], []>} : vector<1x128xbf16>, vector<128x512xbf16>, vector<1x512xf32> -> vector<1x512xf32>
    %107 = arith.addf %103, %106 : vector<1x512xf32>
    %108 = vector.extract_strided_slice %107 {offsets = [0, 0], sizes = [1, 128], strides = [1, 1]} : vector<1x512xf32> to vector<1x128xf32>
    %109 = arith.negf %108 : vector<1x128xf32>
    %110 = math.exp %109 : vector<1x128xf32>
    %cst_34 = arith.constant 1.000000e+00 : f32
    %111 = vector.broadcast %cst_34 : f32 to vector<1x128xf32>
    %112 = arith.addf %111, %110 : vector<1x128xf32>
    %113 = arith.divf %111, %112 : vector<1x128xf32>
    %114 = vector.extract_strided_slice %107 {offsets = [0, 128], sizes = [1, 128], strides = [1, 1]} : vector<1x512xf32> to vector<1x128xf32>
    %115 = arith.negf %114 : vector<1x128xf32>
    %116 = math.exp %115 : vector<1x128xf32>
    %cst_35 = arith.constant 1.000000e+00 : f32
    %117 = vector.broadcast %cst_35 : f32 to vector<1x128xf32>
    %118 = arith.addf %117, %116 : vector<1x128xf32>
    %119 = arith.divf %117, %118 : vector<1x128xf32>
    %120 = vector.extract_strided_slice %107 {offsets = [0, 256], sizes = [1, 128], strides = [1, 1]} : vector<1x512xf32> to vector<1x128xf32>
    %121 = math.tanh %120 : vector<1x128xf32>
    %122 = vector.extract_strided_slice %107 {offsets = [0, 384], sizes = [1, 128], strides = [1, 1]} : vector<1x512xf32> to vector<1x128xf32>
    %123 = arith.negf %122 : vector<1x128xf32>
    %124 = math.exp %123 : vector<1x128xf32>
    %cst_36 = arith.constant 1.000000e+00 : f32
    %125 = vector.broadcast %cst_36 : f32 to vector<1x128xf32>
    %126 = arith.addf %125, %124 : vector<1x128xf32>
    %127 = arith.divf %125, %126 : vector<1x128xf32>
    %128 = arith.mulf %119, %99 : vector<1x128xf32>
    %129 = arith.mulf %113, %121 : vector<1x128xf32>
    %130 = arith.addf %128, %129 : vector<1x128xf32>
    %131 = math.tanh %130 : vector<1x128xf32>
    %132 = arith.mulf %127, %131 : vector<1x128xf32>
    %c4_i32 = arith.constant 4 : i32
    %133 = arith.index_cast %c4_i32 : i32 to index
    %c0_37 = arith.constant 0 : index
    %134 = vector.load %arg7[%133, %c0_37] : memref<8x512xf32, #tpu.memory_space<vmem>>, vector<1x512xf32>
    %135 = arith.truncf %132 : vector<1x128xf32> to vector<1x128xbf16>
    %c0_38 = arith.constant 0 : index
    %c0_39 = arith.constant 0 : index
    %136 = vector.load %arg2[%c0_38, %c0_39] : memref<128x512xbf16, #tpu.memory_space<vmem>>, vector<128x512xbf16>
    %cst_40 = arith.constant dense<0.000000e+00> : vector<1x512xf32>
    %137 = tpu.matmul %135, %136, %cst_40 {dimension_numbers = #tpu.dot_dimension_numbers<[1], [0], [0], [1], [0, 0, 1, 1], [], []>} : vector<1x128xbf16>, vector<128x512xbf16>, vector<1x512xf32> -> vector<1x512xf32>
    %138 = arith.addf %134, %137 : vector<1x512xf32>
    %139 = vector.extract_strided_slice %138 {offsets = [0, 0], sizes = [1, 128], strides = [1, 1]} : vector<1x512xf32> to vector<1x128xf32>
    %140 = arith.negf %139 : vector<1x128xf32>
    %141 = math.exp %140 : vector<1x128xf32>
    %cst_41 = arith.constant 1.000000e+00 : f32
    %142 = vector.broadcast %cst_41 : f32 to vector<1x128xf32>
    %143 = arith.addf %142, %141 : vector<1x128xf32>
    %144 = arith.divf %142, %143 : vector<1x128xf32>
    %145 = vector.extract_strided_slice %138 {offsets = [0, 128], sizes = [1, 128], strides = [1, 1]} : vector<1x512xf32> to vector<1x128xf32>
    %146 = arith.negf %145 : vector<1x128xf32>
    %147 = math.exp %146 : vector<1x128xf32>
    %cst_42 = arith.constant 1.000000e+00 : f32
    %148 = vector.broadcast %cst_42 : f32 to vector<1x128xf32>
    %149 = arith.addf %148, %147 : vector<1x128xf32>
    %150 = arith.divf %148, %149 : vector<1x128xf32>
    %151 = vector.extract_strided_slice %138 {offsets = [0, 256], sizes = [1, 128], strides = [1, 1]} : vector<1x512xf32> to vector<1x128xf32>
    %152 = math.tanh %151 : vector<1x128xf32>
    %153 = vector.extract_strided_slice %138 {offsets = [0, 384], sizes = [1, 128], strides = [1, 1]} : vector<1x512xf32> to vector<1x128xf32>
    %154 = arith.negf %153 : vector<1x128xf32>
    %155 = math.exp %154 : vector<1x128xf32>
    %cst_43 = arith.constant 1.000000e+00 : f32
    %156 = vector.broadcast %cst_43 : f32 to vector<1x128xf32>
    %157 = arith.addf %156, %155 : vector<1x128xf32>
    %158 = arith.divf %156, %157 : vector<1x128xf32>
    %159 = arith.mulf %150, %130 : vector<1x128xf32>
    %160 = arith.mulf %144, %152 : vector<1x128xf32>
    %161 = arith.addf %159, %160 : vector<1x128xf32>
    %162 = math.tanh %161 : vector<1x128xf32>
    %163 = arith.mulf %158, %162 : vector<1x128xf32>
    %c5_i32 = arith.constant 5 : i32
    %164 = arith.index_cast %c5_i32 : i32 to index
    %c0_44 = arith.constant 0 : index
    %165 = vector.load %arg7[%164, %c0_44] : memref<8x512xf32, #tpu.memory_space<vmem>>, vector<1x512xf32>
    %166 = arith.truncf %163 : vector<1x128xf32> to vector<1x128xbf16>
    %c0_45 = arith.constant 0 : index
    %c0_46 = arith.constant 0 : index
    %167 = vector.load %arg2[%c0_45, %c0_46] : memref<128x512xbf16, #tpu.memory_space<vmem>>, vector<128x512xbf16>
    %cst_47 = arith.constant dense<0.000000e+00> : vector<1x512xf32>
    %168 = tpu.matmul %166, %167, %cst_47 {dimension_numbers = #tpu.dot_dimension_numbers<[1], [0], [0], [1], [0, 0, 1, 1], [], []>} : vector<1x128xbf16>, vector<128x512xbf16>, vector<1x512xf32> -> vector<1x512xf32>
    %169 = arith.addf %165, %168 : vector<1x512xf32>
    %170 = vector.extract_strided_slice %169 {offsets = [0, 0], sizes = [1, 128], strides = [1, 1]} : vector<1x512xf32> to vector<1x128xf32>
    %171 = arith.negf %170 : vector<1x128xf32>
    %172 = math.exp %171 : vector<1x128xf32>
    %cst_48 = arith.constant 1.000000e+00 : f32
    %173 = vector.broadcast %cst_48 : f32 to vector<1x128xf32>
    %174 = arith.addf %173, %172 : vector<1x128xf32>
    %175 = arith.divf %173, %174 : vector<1x128xf32>
    %176 = vector.extract_strided_slice %169 {offsets = [0, 128], sizes = [1, 128], strides = [1, 1]} : vector<1x512xf32> to vector<1x128xf32>
    %177 = arith.negf %176 : vector<1x128xf32>
    %178 = math.exp %177 : vector<1x128xf32>
    %cst_49 = arith.constant 1.000000e+00 : f32
    %179 = vector.broadcast %cst_49 : f32 to vector<1x128xf32>
    %180 = arith.addf %179, %178 : vector<1x128xf32>
    %181 = arith.divf %179, %180 : vector<1x128xf32>
    %182 = vector.extract_strided_slice %169 {offsets = [0, 256], sizes = [1, 128], strides = [1, 1]} : vector<1x512xf32> to vector<1x128xf32>
    %183 = math.tanh %182 : vector<1x128xf32>
    %184 = vector.extract_strided_slice %169 {offsets = [0, 384], sizes = [1, 128], strides = [1, 1]} : vector<1x512xf32> to vector<1x128xf32>
    %185 = arith.negf %184 : vector<1x128xf32>
    %186 = math.exp %185 : vector<1x128xf32>
    %cst_50 = arith.constant 1.000000e+00 : f32
    %187 = vector.broadcast %cst_50 : f32 to vector<1x128xf32>
    %188 = arith.addf %187, %186 : vector<1x128xf32>
    %189 = arith.divf %187, %188 : vector<1x128xf32>
    %190 = arith.mulf %181, %161 : vector<1x128xf32>
    %191 = arith.mulf %175, %183 : vector<1x128xf32>
    %192 = arith.addf %190, %191 : vector<1x128xf32>
    %193 = math.tanh %192 : vector<1x128xf32>
    %194 = arith.mulf %189, %193 : vector<1x128xf32>
    %c6_i32 = arith.constant 6 : i32
    %195 = arith.index_cast %c6_i32 : i32 to index
    %c0_51 = arith.constant 0 : index
    %196 = vector.load %arg7[%195, %c0_51] : memref<8x512xf32, #tpu.memory_space<vmem>>, vector<1x512xf32>
    %197 = arith.truncf %194 : vector<1x128xf32> to vector<1x128xbf16>
    %c0_52 = arith.constant 0 : index
    %c0_53 = arith.constant 0 : index
    %198 = vector.load %arg2[%c0_52, %c0_53] : memref<128x512xbf16, #tpu.memory_space<vmem>>, vector<128x512xbf16>
    %cst_54 = arith.constant dense<0.000000e+00> : vector<1x512xf32>
    %199 = tpu.matmul %197, %198, %cst_54 {dimension_numbers = #tpu.dot_dimension_numbers<[1], [0], [0], [1], [0, 0, 1, 1], [], []>} : vector<1x128xbf16>, vector<128x512xbf16>, vector<1x512xf32> -> vector<1x512xf32>
    %200 = arith.addf %196, %199 : vector<1x512xf32>
    %201 = vector.extract_strided_slice %200 {offsets = [0, 0], sizes = [1, 128], strides = [1, 1]} : vector<1x512xf32> to vector<1x128xf32>
    %202 = arith.negf %201 : vector<1x128xf32>
    %203 = math.exp %202 : vector<1x128xf32>
    %cst_55 = arith.constant 1.000000e+00 : f32
    %204 = vector.broadcast %cst_55 : f32 to vector<1x128xf32>
    %205 = arith.addf %204, %203 : vector<1x128xf32>
    %206 = arith.divf %204, %205 : vector<1x128xf32>
    %207 = vector.extract_strided_slice %200 {offsets = [0, 128], sizes = [1, 128], strides = [1, 1]} : vector<1x512xf32> to vector<1x128xf32>
    %208 = arith.negf %207 : vector<1x128xf32>
    %209 = math.exp %208 : vector<1x128xf32>
    %cst_56 = arith.constant 1.000000e+00 : f32
    %210 = vector.broadcast %cst_56 : f32 to vector<1x128xf32>
    %211 = arith.addf %210, %209 : vector<1x128xf32>
    %212 = arith.divf %210, %211 : vector<1x128xf32>
    %213 = vector.extract_strided_slice %200 {offsets = [0, 256], sizes = [1, 128], strides = [1, 1]} : vector<1x512xf32> to vector<1x128xf32>
    %214 = math.tanh %213 : vector<1x128xf32>
    %215 = vector.extract_strided_slice %200 {offsets = [0, 384], sizes = [1, 128], strides = [1, 1]} : vector<1x512xf32> to vector<1x128xf32>
    %216 = arith.negf %215 : vector<1x128xf32>
    %217 = math.exp %216 : vector<1x128xf32>
    %cst_57 = arith.constant 1.000000e+00 : f32
    %218 = vector.broadcast %cst_57 : f32 to vector<1x128xf32>
    %219 = arith.addf %218, %217 : vector<1x128xf32>
    %220 = arith.divf %218, %219 : vector<1x128xf32>
    %221 = arith.mulf %212, %192 : vector<1x128xf32>
    %222 = arith.mulf %206, %214 : vector<1x128xf32>
    %223 = arith.addf %221, %222 : vector<1x128xf32>
    %224 = math.tanh %223 : vector<1x128xf32>
    %225 = arith.mulf %220, %224 : vector<1x128xf32>
    %c7_i32 = arith.constant 7 : i32
    %226 = arith.index_cast %c7_i32 : i32 to index
    %c0_58 = arith.constant 0 : index
    %227 = vector.load %arg7[%226, %c0_58] : memref<8x512xf32, #tpu.memory_space<vmem>>, vector<1x512xf32>
    %228 = arith.truncf %225 : vector<1x128xf32> to vector<1x128xbf16>
    %c0_59 = arith.constant 0 : index
    %c0_60 = arith.constant 0 : index
    %229 = vector.load %arg2[%c0_59, %c0_60] : memref<128x512xbf16, #tpu.memory_space<vmem>>, vector<128x512xbf16>
    %cst_61 = arith.constant dense<0.000000e+00> : vector<1x512xf32>
    %230 = tpu.matmul %228, %229, %cst_61 {dimension_numbers = #tpu.dot_dimension_numbers<[1], [0], [0], [1], [0, 0, 1, 1], [], []>} : vector<1x128xbf16>, vector<128x512xbf16>, vector<1x512xf32> -> vector<1x512xf32>
    %231 = arith.addf %227, %230 : vector<1x512xf32>
    %232 = vector.extract_strided_slice %231 {offsets = [0, 0], sizes = [1, 128], strides = [1, 1]} : vector<1x512xf32> to vector<1x128xf32>
    %233 = arith.negf %232 : vector<1x128xf32>
    %234 = math.exp %233 : vector<1x128xf32>
    %cst_62 = arith.constant 1.000000e+00 : f32
    %235 = vector.broadcast %cst_62 : f32 to vector<1x128xf32>
    %236 = arith.addf %235, %234 : vector<1x128xf32>
    %237 = arith.divf %235, %236 : vector<1x128xf32>
    %238 = vector.extract_strided_slice %231 {offsets = [0, 128], sizes = [1, 128], strides = [1, 1]} : vector<1x512xf32> to vector<1x128xf32>
    %239 = arith.negf %238 : vector<1x128xf32>
    %240 = math.exp %239 : vector<1x128xf32>
    %cst_63 = arith.constant 1.000000e+00 : f32
    %241 = vector.broadcast %cst_63 : f32 to vector<1x128xf32>
    %242 = arith.addf %241, %240 : vector<1x128xf32>
    %243 = arith.divf %241, %242 : vector<1x128xf32>
    %244 = vector.extract_strided_slice %231 {offsets = [0, 256], sizes = [1, 128], strides = [1, 1]} : vector<1x512xf32> to vector<1x128xf32>
    %245 = math.tanh %244 : vector<1x128xf32>
    %246 = vector.extract_strided_slice %231 {offsets = [0, 384], sizes = [1, 128], strides = [1, 1]} : vector<1x512xf32> to vector<1x128xf32>
    %247 = arith.negf %246 : vector<1x128xf32>
    %248 = math.exp %247 : vector<1x128xf32>
    %cst_64 = arith.constant 1.000000e+00 : f32
    %249 = vector.broadcast %cst_64 : f32 to vector<1x128xf32>
    %250 = arith.addf %249, %248 : vector<1x128xf32>
    %251 = arith.divf %249, %250 : vector<1x128xf32>
    %252 = arith.mulf %243, %223 : vector<1x128xf32>
    %253 = arith.mulf %237, %245 : vector<1x128xf32>
    %254 = arith.addf %252, %253 : vector<1x128xf32>
    %255 = math.tanh %254 : vector<1x128xf32>
    %256 = arith.mulf %251, %255 : vector<1x128xf32>
    %c8_i32 = arith.constant 8 : i32
    %c0_65 = arith.constant 0 : index
    %c0_66 = arith.constant 0 : index
    %257 = vector.load %arg4[%c0_65, %c0_66] : memref<128x128xf32, #tpu.memory_space<vmem>>, vector<128x128xf32>
    %cst_67 = arith.constant dense<0.000000e+00> : vector<1x128xf32>
    %258 = tpu.matmul %256, %257, %cst_67 {dimension_numbers = #tpu.dot_dimension_numbers<[1], [0], [0], [1], [0, 0, 1, 1], [], []>} : vector<1x128xf32>, vector<128x128xf32>, vector<1x128xf32> -> vector<1x128xf32>
    %c0_68 = arith.constant 0 : index
    %c0_69 = arith.constant 0 : index
    %259 = vector.load %arg5[%c0_68, %c0_69] : memref<1x128xf32, #tpu.memory_space<vmem>>, vector<1x128xf32>
    %260 = arith.addf %258, %259 : vector<1x128xf32>
    %c0_70 = arith.constant 0 : index
    %c0_71 = arith.constant 0 : index
    %261 = vector.load %arg6[%c0_70, %c0_71] : memref<1x128xf32, #tpu.memory_space<vmem>>, vector<1x128xf32>
    tpu.vector_store %arg6[%c0_70, %c0_71], %260 {strides = array<i32>} : memref<1x128xf32, #tpu.memory_space<vmem>>, vector<1x128xf32>,
    return
  }
}

</mosaic_0001>

<bundles_post_ra>
// kernel: my_lstm_forward.1
= control target key start
LH: loop header
LB: loop body
LE: loop exit
PB: predicated region body
PF: predicated region fallthrough
CT: control target
= control target key end

     0   :  { %11 = vsyncpa [#allocation4], 0  ;;  %s2579_s0 = inlined_call_operand.vmem [shape: f32[8,16], index: 0, kind: input, shape index: {}]   ;;  %s2580_s1 = inlined_call_operand.hbm [shape: f32[16,512], index: 1, kind: input, shape index: {}]   ;;  %s2581_s2 = inlined_call_operand.hbm [shape: bf16[128,512], index: 2, kind: input, shape index: {}]   ;;  %s2582_s3 = inlined_call_operand.vmem [shape: f32[1,512], index: 3, kind: input, shape index: {}]   ;;  %s2583_s4 = inlined_call_operand.hbm [shape: f32[128,128], index: 4, kind: input, shape index: {}]   ;;  %s2584_s5 = inlined_call_operand.vmem [shape: f32[1,128], index: 5, kind: input, shape index: {}]   ;;  %s2585_s6 = inlined_call_operand.vmem [shape: f32[1,128], index: 6, kind: output, shape index: {}]  }
   0x1   :  { %12 = vsyncpa [#allocation6], 0  ;;  %s2093_s21 = smov [#allocation5]  }
   0x2   :  { %s32_s22 = sshll.u32 %s2093_s21, 4  ;;  %s33_s22 = int_to_ptr.vmem [resolvable:$true] %s32_s22 }
   0x3   :  { %s2037_s23 = scalar_lea.vmem %s33_s22, 4096  ;;  %p2042_p1 = scmp.lt.s32.totalorder %s33_s22, %s33_s22 }
   0x4   :  { %p2038_p0 = scmp.ne.s32.totalorder %s33_s22, %s2037_s23  ;;  %p2043_p2 = scmp.lt.s32.totalorder %s2037_s23, %s2037_s23 }
   0x6   :  { %p2044_p3 = por %p2043_p2, %p2042_p1 }
   0x8   :  { %p2045_p4 = pnand %p2044_p3, %p2038_p0 }
   0xa   :  { %2048 = shalt.err (!%p2045_p4)
}
   0xb   :  { %s2094_s24 = smov 256   ;;  %s2095_s25 = smov 16  }
   0xc   :  { %38 = dma.hbm_to_vmem [thread:$0]  %s2581_s2, 4096, %s33_s22, [#allocation6], %s2094_s24, %s2094_s24, %s2095_s25  }
   0xd   :  { %s2096_s28 = smov [#allocation3]  }
   0xe   :  { %s20_s29 = sshll.u32 %s2096_s28, 4  ;;  %s21_s29 = int_to_ptr.vmem [resolvable:$true] %s20_s29 }
   0xf   :  { %s2057_s30 = scalar_lea.vmem %s21_s29, 1024  ;;  %p2062_p6 = scmp.lt.s32.totalorder %s21_s29, %s21_s29 }
  0x10   :  { %p2058_p5 = scmp.ne.s32.totalorder %s21_s29, %s2057_s30  ;;  %p2063_p7 = scmp.lt.s32.totalorder %s2057_s30, %s2057_s30 }
  0x12   :  { %p2064_p8 = por %p2063_p7, %p2062_p6 }
  0x14   :  { %p2065_p9 = pnand %p2064_p8, %p2058_p5 }
  0x16   :  { %2068 = shalt.err (!%p2065_p9)
}
  0x17   :  { %s2097_s7 = smov 512   ;;  %s2098_s8 = smov 32  }
  0x18   :  { %26 = dma.hbm_to_vmem [thread:$0]  %s2580_s1, 1024, %s21_s29, [#allocation4], %s2097_s7, %s2097_s7, %s2098_s8  }
  0x19   :  { %s2099_s11 = smov [#allocation7]  }
  0x1a   :  { %s46_s12 = sshll.u32 %s2099_s11, 4  ;;  %s47_s12 = int_to_ptr.vmem [resolvable:$true] %s46_s12 }
  0x1b   :  { %s2077_s2 = scalar_lea.vmem %s47_s12, 2048  ;;  %p2082_p11 = scmp.lt.s32.totalorder %s47_s12, %s47_s12 }
  0x1c   :  { %p2078_p10 = scmp.ne.s32.totalorder %s47_s12, %s2077_s2  ;;  %p2083_p12 = scmp.lt.s32.totalorder %s2077_s2, %s2077_s2 }
  0x1e   :  { %p2084_p13 = por %p2083_p12, %p2082_p11 }
  0x20   :  { %p2085_p0 = pnand %p2084_p13, %p2078_p10 }
  0x22   :  { %2088 = shalt.err (!%p2085_p0)
}
  0x23   :  { %s2100_s13 = smov 128   ;;  %s2101_s14 = smov 8  }
  0x24   :  { %52 = dma.hbm_to_vmem [thread:$0]  %s2583_s4, 2048, %s47_s12, [#allocation6], %s2100_s13, %s2100_s13, %s2101_s14  }
  0x25   :  { %2089 = dma.done.wait [#allocation4], 1024  }
  0x26   :  { %2090 = vsyncadd [#allocation4], 4294966272 }
  0x27   :  { %2091 = dma.done.wait [#allocation6], 6144  }
  0x28   :  { %2092 = vsyncadd [#allocation6], 4294961152  ;;  %v2102_v0 = vmov 0.0   ;;  %v2103_v1 = vmov 0   ;;  %v71_v2 = vld [vmem:[#allocation3 + $0x28] sm:$0xff]  ;;  %v70_v3 = vld [vmem:[#allocation3 + $0x20] sm:$0xff]  ;;  %v76_v43 = vlaneseq }
  0x29   :  { %164 = vmatprep.mubr.f32.mxu1 %v2102_v0  ;;  %471 = vmatprep.mubr.bf16.mxu0 %v2103_v1  ;;  %v67_v4 = vld [vmem:[#allocation3 + $0x8] sm:$0xff]  ;;  %v2152_v5 = vld [vmem:[#allocation5 + $0xe4] ss:$16 sps:$4 sm:$0xff]   ;;  %v2154_v7 = vld [vmem:[#allocation5 + $0xe0] ss:$16 sps:$4 sm:$0xff]   ;;  %vm96_vm0 = vcmask 130048  }
  0x2a   :  { %128 = vmatprep.subr.mxu1 %v71_v2  ;;  %v66_v6 = vld [vmem:[#allocation3] sm:$0xff]  ;;  %439 = vmatprep.subr.bf16.mxu0 %v2152_v5  ;;  %v73_v9 = vld [vmem:[#allocation3 + $0x38] sm:$0xff]  ;;  %v72_v10 = vld [vmem:[#allocation3 + $0x30] sm:$0xff]  ;;  %v77_v44 = vshrl.u32 %v76_v43, 7  ;;  %v2104_v62 = vmov 1966171168  }
  0x2b   :  { %129 = vmatpush1.msra.mxu1 %v70_v3  ;;  %v65_v8 = vld [vmem:[%s2579_s0] sm:$0xff]  ;;  %v69_v11 = vld [vmem:[#allocation3 + $0x18] sm:$0xff]  ;;  %440 = vmatpush1.bf16.msra.mxu0 %v2154_v7  ;;  %v68_v13 = vld [vmem:[#allocation3 + $0x10] sm:$0xff]  ;;  %v528_v63 = vunpack.c.l.s4 %v2104_v62  ;;  %vm2105_vm1 = vmmov 0  }
  0x2c   :  { %130 = vmatprep.subr.mxu1 %v67_v4  ;;  %v2161_v12 = vld [vmem:[#allocation5 + $0xc4] ss:$16 sps:$4 sm:$0xff]   ;;  %v2164_v14 = vld [vmem:[#allocation5 + $0xc0] ss:$16 sps:$4 sm:$0xff]   ;;  %v2167_v15 = vld [vmem:[#allocation5 + $0xec] ss:$16 sps:$4 sm:$0xff]  }
  0x2d   :  { %131 = vmatpush1.msra.mxu1 %v66_v6  ;;  %441 = vmatprep.subr.bf16.mxu0 %v2161_v12  ;;  %v2169_v16 = vld [vmem:[#allocation5 + $0xe8] ss:$16 sps:$4 sm:$0xff]   ;;  %v2172_v17 = vld [vmem:[#allocation5 + $0xa4] ss:$16 sps:$4 sm:$0xff]   ;;  %v2175_v18 = vld [vmem:[#allocation5 + $0xa0] ss:$16 sps:$4 sm:$0xff]   ;;  %v529_v4 = vunpack.c.0.s8 %v528_v63 }
  0x2e   :  { %1698 = vmatmul.mubr.msk.f32.vlgmr.msra.gmra.mxu1 %vm96_vm0, %v65_v8  ;;  %199 = vmatprep.subr.mxu1 %v73_v9  ;;  %v2179_v19 = vld [vmem:[#allocation5 + $0xcc] ss:$16 sps:$4 sm:$0xff]   ;;  %v2183_v20 = vld [vmem:[#allocation5 + $0xc8] ss:$16 sps:$4 sm:$0xff]   ;;  %v2185_v21 = vld [vmem:[#allocation5 + $0x84] ss:$16 sps:$4 sm:$0xff]  }
  0x2f   :  { %200 = vmatpush1.msra.mxu1 %v72_v10  ;;  %235 = vmatprep.mubr.f32.mxu1 %v2102_v0  ;;  %v2188_v22 = vld [vmem:[#allocation5 + $0xac] ss:$16 sps:$4 sm:$0xff]   ;;  %v2192_v23 = vld [vmem:[#allocation5 + $0x80] ss:$16 sps:$4 sm:$0xff]   ;;  %v2195_v24 = vld [vmem:[#allocation5 + $0x64] ss:$16 sps:$4 sm:$0xff]   ;;  %v2296_v10 = vsub.s32 %v529_v4, %v77_v44 }
  0x30   :  { %201 = vmatprep.subr.mxu1 %v69_v11  ;;  %442 = vmatpush1.bf16.msra.mxu0 %v2164_v14  ;;  %v2198_v25 = vld [vmem:[#allocation5 + $0xa8] ss:$16 sps:$4 sm:$0xff]   ;;  %v2201_v26 = vld [vmem:[#allocation5 + $0x8c] ss:$16 sps:$4 sm:$0xff]   ;;  %v2204_v27 = vld [vmem:[#allocation5 + $0x60] ss:$16 sps:$4 sm:$0xff]  }
  0x31   :  { %202 = vmatpush1.msra.mxu1 %v68_v13  ;;  %443 = vmatprep.subr.bf16.mxu0 %v2172_v17  ;;  %v2207_v28 = vld [vmem:[#allocation5 + $0x44] ss:$16 sps:$4 sm:$0xff]   ;;  %v2210_v29 = vld [vmem:[#allocation5 + $0x88] ss:$16 sps:$4 sm:$0xff]   ;;  %v2213_v30 = vld [vmem:[#allocation5 + $0x6c] ss:$16 sps:$4 sm:$0xff]  }
  0x32   :  { %1699 = vmatmul.mubr.msk.f32.vlgmr.msra.gmra.mxu1 %vm96_vm0, %v65_v8  ;;  %480 = vmatprep.subr.bf16.mxu1 %v2167_v15  ;;  %v2216_v31 = vld [vmem:[#allocation5 + $0x40] ss:$16 sps:$4 sm:$0xff]   ;;  %v2219_v32 = vld [vmem:[#allocation5 + $0x24] ss:$16 sps:$4 sm:$0xff]   ;;  %v2222_v33 = vld [vmem:[#allocation5 + $0x68] ss:$16 sps:$4 sm:$0xff]  }
  0x33   :  { %481 = vmatpush1.bf16.msra.mxu1 %v2169_v16  ;;  %512 = vmatprep.mubr.bf16.mxu1 %v2103_v1  ;;  %v2225_v34 = vld [vmem:[#allocation5 + $0x4c] ss:$16 sps:$4 sm:$0xff]   ;;  %v2228_v35 = vld [vmem:[#allocation5 + $0x20] ss:$16 sps:$4 sm:$0xff]   ;;  %v2231_v36 = vld [vmem:[#allocation5 + $0x4] ss:$16 sps:$4 sm:$0xff]  }
  0x34   :  { %482 = vmatprep.subr.bf16.mxu1 %v2179_v19  ;;  %444 = vmatpush1.bf16.msra.mxu0 %v2175_v18  ;;  %v2234_v37 = vld [vmem:[#allocation5 + $0x48] ss:$16 sps:$4 sm:$0xff]   ;;  %v2237_v38 = vld [vmem:[#allocation5 + $0x2c] ss:$16 sps:$4 sm:$0xff]   ;;  %v2240_v39 = vld [vmem:[#allocation5] ss:$16 sps:$4 sm:$0xff]  }
  0x35   :  { %445 = vmatprep.subr.bf16.mxu0 %v2185_v21  ;;  %v2244_v40 = vld [vmem:[#allocation5 + $0x28] ss:$16 sps:$4 sm:$0xff]   ;;  %v2247_v41 = vld [vmem:[#allocation5 + $0xc] ss:$16 sps:$4 sm:$0xff]   ;;  %v78_v45 = vsub.s32 0, %v77_v44  ;;  %v82_v47 = vsub.s32 1, %v77_v44 }
  0x36   :  { %v2252_v42 = vld [vmem:[#allocation5 + $0x8] ss:$16 sps:$4 sm:$0xff]   ;;  %v74_v46 = vld [vmem:[%s2582_s3] sm:$0xf]  ;;  %v86_v49 = vsub.s32 2, %v77_v44  ;;  %v90_v51 = vsub.s32 3, %v77_v44 }
  0x37   :  { %483 = vmatpush1.bf16.msra.mxu1 %v2183_v20  ;;  %v79_v48 = vrot.slane %v74_v46, %v78_v45  ;;  %v83_v50 = vrot.slane %v74_v46, %v82_v47 }
  0x38   :  { %484 = vmatprep.subr.bf16.mxu1 %v2188_v22  ;;  %446 = vmatpush1.bf16.msra.mxu0 %v2192_v23  ;;  %v87_v54 = vrot.slane %v74_v46, %v86_v49  ;;  %v91_v57 = vrot.slane %v74_v46, %v90_v51 }
  0x39   :  { %447 = vmatprep.subr.bf16.mxu0 %v2195_v24 }
  0x3b   :  { %485 = vmatpush1.bf16.msra.mxu1 %v2198_v25 }
  0x3c   :  { %486 = vmatprep.subr.bf16.mxu1 %v2201_v26  ;;  %448 = vmatpush1.bf16.msra.mxu0 %v2204_v27 }
  0x3d   :  { %449 = vmatprep.subr.bf16.mxu0 %v2207_v28 }
  0x3f   :  { %487 = vmatpush1.bf16.msra.mxu1 %v2210_v29 }
  0x40   :  { %488 = vmatprep.subr.bf16.mxu1 %v2213_v30  ;;  %450 = vmatpush1.bf16.msra.mxu0 %v2216_v31 }
  0x41   :  { %451 = vmatprep.subr.bf16.mxu0 %v2219_v32 }
  0x43   :  { %489 = vmatpush1.bf16.msra.mxu1 %v2222_v33 }
  0x44   :  { %490 = vmatprep.subr.bf16.mxu1 %v2225_v34  ;;  %452 = vmatpush1.bf16.msra.mxu0 %v2228_v35 }
  0x45   :  { %453 = vmatprep.subr.bf16.mxu0 %v2231_v36 }
  0x47   :  { %491 = vmatpush1.bf16.msra.mxu1 %v2234_v37 }
  0x48   :  { %492 = vmatprep.subr.bf16.mxu1 %v2237_v38  ;;  %454 = vmatpush1.bf16.msra.mxu0 %v2240_v39 }
  0x49   :  { %585 = vmatprep.subr.bf16.mxu0 %v2152_v5 }
  0x4b   :  { %493 = vmatpush1.bf16.msra.mxu1 %v2244_v40  ;;  %472 = vmatmul.mubr.bf16.vlgmr.msra.gmra.mxu0 %v2103_v1 }
  0x4c   :  { %494 = vmatprep.subr.bf16.mxu1 %v2247_v41  ;;  %586 = vmatpush1.bf16.msra.mxu0 %v2154_v7 }
  0x4d   :  { %617 = vmatprep.mubr.bf16.mxu0 %v2103_v1  ;;  %587 = vmatprep.subr.bf16.mxu0 %v2161_v12 }
  0x4f   :  { %495 = vmatpush1.bf16.msra.mxu1 %v2252_v42 }
  0x50   :  { %626 = vmatprep.subr.bf16.mxu1 %v2167_v15  ;;  %588 = vmatpush1.bf16.msra.mxu0 %v2164_v14 }
  0x51   :  { %589 = vmatprep.subr.bf16.mxu0 %v2172_v17 }
  0x52   :  { %513 = vmatmul.mubr.bf16.vlgmr.msra.gmra.mxu1 %v2103_v1 }
  0x53   :  { %627 = vmatpush1.bf16.msra.mxu1 %v2169_v16  ;;  %658 = vmatprep.mubr.bf16.mxu1 %v2103_v1 }
  0x54   :  { %628 = vmatprep.subr.bf16.mxu1 %v2179_v19  ;;  %590 = vmatpush1.bf16.msra.mxu0 %v2175_v18 }
  0x55   :  { %591 = vmatprep.subr.bf16.mxu0 %v2185_v21 }
  0x57   :  { %629 = vmatpush1.bf16.msra.mxu1 %v2183_v20 }
  0x58   :  { %630 = vmatprep.subr.bf16.mxu1 %v2188_v22  ;;  %592 = vmatpush1.bf16.msra.mxu0 %v2192_v23 }
  0x59   :  { %593 = vmatprep.subr.bf16.mxu0 %v2195_v24 }
  0x5b   :  { %631 = vmatpush1.bf16.msra.mxu1 %v2198_v25 }
  0x5c   :  { %632 = vmatprep.subr.bf16.mxu1 %v2201_v26  ;;  %594 = vmatpush1.bf16.msra.mxu0 %v2204_v27 }
  0x5d   :  { %595 = vmatprep.subr.bf16.mxu0 %v2207_v28 }
  0x5f   :  { %633 = vmatpush1.bf16.msra.mxu1 %v2210_v29 }
  0x60   :  { %634 = vmatprep.subr.bf16.mxu1 %v2213_v30  ;;  %596 = vmatpush1.bf16.msra.mxu0 %v2216_v31 }
  0x61   :  { %597 = vmatprep.subr.bf16.mxu0 %v2219_v32 }
  0x63   :  { %635 = vmatpush1.bf16.msra.mxu1 %v2222_v33 }
  0x64   :  { %636 = vmatprep.subr.bf16.mxu1 %v2225_v34  ;;  %598 = vmatpush1.bf16.msra.mxu0 %v2228_v35 }
  0x65   :  { %599 = vmatprep.subr.bf16.mxu0 %v2231_v36 }
  0x67   :  { %637 = vmatpush1.bf16.msra.mxu1 %v2234_v37 }
  0x68   :  { %638 = vmatprep.subr.bf16.mxu1 %v2237_v38  ;;  %600 = vmatpush1.bf16.msra.mxu0 %v2240_v39 }
  0x69   :  { %731 = vmatprep.subr.bf16.mxu0 %v2152_v5 }
  0x6b   :  { %639 = vmatpush1.bf16.msra.mxu1 %v2244_v40 }
  0x6c   :  { %640 = vmatprep.subr.bf16.mxu1 %v2247_v41 }
  0x6f   :  { %641 = vmatpush1.bf16.msra.mxu1 %v2252_v42 }
  0x70   :  { %772 = vmatprep.subr.bf16.mxu1 %v2167_v15 }
  0xee   :  { %v166_v52 = vpop.f32.mrf.mxu1 }
  0xef   :  { %v167_v53 = vadd.f32 %v166_v52, %v79_v48 }
  0xf0   :  { %v168_v55 = vpop.f32.mrf.mxu1 }
  0xf1   :  { %242 = vst [vmem:[#allocation2] sm:$0xff] %v167_v53  ;;  %v169_v56 = vadd.f32 %v168_v55, %v83_v50 }
  0xf2   :  { %v237_v58 = vpop.f32.mrf.mxu1 }
  0xf3   :  { %243 = vst [vmem:[#allocation2 + $0x8] sm:$0xff] %v169_v56  ;;  %v238_v59 = vadd.f32 %v237_v58, %v87_v54 }
  0xf4   :  { %v239_v60 = vpop.f32.mrf.mxu1 }
  0xf5   :  { %244 = vst [vmem:[#allocation2 + $0x10] sm:$0xff] %v238_v59  ;;  %v240_v61 = vadd.f32 %v239_v60, %v91_v57 }
  0xf7   :  { %245 = vst [vmem:[#allocation2 + $0x18] sm:$0xff] %v240_v61 }
  0xfe   :  { %v246_v51 = vld [vmem:[#allocation2] ss:$8 sm:$0xf] }
 0x10b   :  { %v473_v2 = vpop.f32.mrf.mxu0 }
 0x10d   :  { %v475_v3 = vpop.f32.mrf.mxu0 }
 0x10e   :  { %v525_v11 = vcombine.low %v473_v2, %v475_v3 }
 0x10f   :  { %v477_v6 = vpop.f32.mrf.mxu0 }
 0x110   :  { %v533_v46 = vrot.slane %v525_v11, %v2296_v10 }
 0x111   :  { %v478_v8 = vpop.f32.mrf.mxu0 }
 0x112   :  { %v514_v9 = vpop.f32.mrf.mxu1 }
 0x114   :  { %v516_v13 = vpop.f32.mrf.mxu1 }
 0x115   :  { %v526_v43 = vcombine.low %v514_v9, %v516_v13 }
 0x116   :  { %v518_v45 = vpop.f32.mrf.mxu1 }
 0x117   :  { %v540_v47 = vrot.slane %v526_v43, %v2296_v10 }
 0x118   :  { %v519_v48 = vpop.f32.mrf.mxu1 }
 0x119   :  { %v541_v49 = vcombine.low %v533_v46, %v540_v47 }
 0x11b   :  { %v548_v50 = vrot.slane %v541_v49, %v2296_v10 }
 0x11d   :  { %v550_v52 = vadd.f32 %v548_v50, %v246_v51 }
 0x11f   :  { %v1732_v53 = vmul.f32 -1.442695, %v550_v52  ;;  %v558_v54 = vrot.slane %v550_v52, 1  ;;  %v569_v44 = vrot.slane %v550_v52, 3  ;;  %v566_v58 = vrot.slane %v550_v52, 2 }
 0x121   :  { %1869 = vpow2.f32 %v1732_v53  ;;  %v1733_v55 = vmul.f32 -1.442695, %v558_v54  ;;  %v1734_v56 = vmul.f32 -1.442695, %v569_v44 }
 0x123   :  { %1871 = vpow2.f32 %v1733_v55 }
 0x124   :  { %1873 = vpow2.f32 %v1734_v56 }
 0x12e   :  { %v1870_v57 = vpop.eup %1869 }
 0x12f   :  { %v554_v59 = vadd.f32 1.0, %v1870_v57 }
 0x130   :  { %v1872_v60 = vpop.eup %1871 }
 0x131   :  { %1875 = vrcp.f32 %v554_v59  ;;  %v563_v61 = vadd.f32 1.0, %v1872_v60  ;;  %v1874_v62 = vpop.eup %1873  ;;  %v583_v59 = vld [vmem:[#allocation2 + $0x1] ss:$8 sm:$0xf] }
 0x132   :  { %1877 = vtanh.f32 %v566_v58  ;;  %v574_v4 = vadd.f32 1.0, %v1874_v62 }
 0x133   :  { %1879 = vrcp.f32 %v563_v61 }
 0x134   :  { %1881 = vrcp.f32 %v574_v4 }
 0x13e   :  { %v1876_v63 = vpop.eup %1875 }
 0x13f   :  { %v1878_v2 = vpop.eup %1877 }
 0x140   :  { %v1880_v3 = vpop.eup %1879  ;;  %v578_v8 = vmul.f32 %v1878_v2, %v1876_v63 }
 0x141   :  { %v577_v6 = vmul.f32 0.0, %v1880_v3  ;;  %v1882_v11 = vpop.eup %1881 }
 0x143   :  { %v2301_v9 = vadd.f32 %v578_v8, %v577_v6 }
 0x145   :  { %1883 = vtanh.f32 %v2301_v9 }
 0x152   :  { %v1884_v13 = vpop.eup %1883 }
 0x153   :  { %v581_v43 = vmul.f32 %v1884_v13, %v1882_v11 }
 0x155   :  { %v584_v45 = vpack.c.bf16 %v581_v43, %v581_v43 }
 0x157   :  { %618 = vmatmul.mubr.bf16.vlgmr.msra.gmra.mxu0 %v584_v45  ;;  %659 = vmatmul.mubr.bf16.vlgmr.msra.gmra.mxu1 %v584_v45 }
 0x158   :  { %732 = vmatpush1.bf16.msra.mxu0 %v2154_v7  ;;  %773 = vmatpush1.bf16.msra.mxu1 %v2169_v16 }
 0x159   :  { %733 = vmatprep.subr.bf16.mxu0 %v2161_v12  ;;  %774 = vmatprep.subr.bf16.mxu1 %v2179_v19 }
 0x15a   :  { %763 = vmatprep.mubr.bf16.mxu0 %v2103_v1  ;;  %804 = vmatprep.mubr.bf16.mxu1 %v2103_v1 }
 0x15c   :  { %734 = vmatpush1.bf16.msra.mxu0 %v2164_v14  ;;  %775 = vmatpush1.bf16.msra.mxu1 %v2183_v20 }
 0x15d   :  { %735 = vmatprep.subr.bf16.mxu0 %v2172_v17  ;;  %776 = vmatprep.subr.bf16.mxu1 %v2188_v22 }
 0x160   :  { %736 = vmatpush1.bf16.msra.mxu0 %v2175_v18  ;;  %777 = vmatpush1.bf16.msra.mxu1 %v2198_v25 }
 0x161   :  { %737 = vmatprep.subr.bf16.mxu0 %v2185_v21  ;;  %778 = vmatprep.subr.bf16.mxu1 %v2201_v26 }
 0x164   :  { %738 = vmatpush1.bf16.msra.mxu0 %v2192_v23  ;;  %779 = vmatpush1.bf16.msra.mxu1 %v2210_v29 }
 0x165   :  { %739 = vmatprep.subr.bf16.mxu0 %v2195_v24  ;;  %780 = vmatprep.subr.bf16.mxu1 %v2213_v30 }
 0x168   :  { %740 = vmatpush1.bf16.msra.mxu0 %v2204_v27  ;;  %781 = vmatpush1.bf16.msra.mxu1 %v2222_v33 }
 0x169   :  { %741 = vmatprep.subr.bf16.mxu0 %v2207_v28  ;;  %782 = vmatprep.subr.bf16.mxu1 %v2225_v34 }
 0x16c   :  { %742 = vmatpush1.bf16.msra.mxu0 %v2216_v31  ;;  %783 = vmatpush1.bf16.msra.mxu1 %v2234_v37 }
 0x16d   :  { %743 = vmatprep.subr.bf16.mxu0 %v2219_v32  ;;  %784 = vmatprep.subr.bf16.mxu1 %v2237_v38 }
 0x170   :  { %744 = vmatpush1.bf16.msra.mxu0 %v2228_v35  ;;  %785 = vmatpush1.bf16.msra.mxu1 %v2244_v40 }
 0x171   :  { %745 = vmatprep.subr.bf16.mxu0 %v2231_v36  ;;  %786 = vmatprep.subr.bf16.mxu1 %v2247_v41 }
 0x174   :  { %746 = vmatpush1.bf16.msra.mxu0 %v2240_v39  ;;  %787 = vmatpush1.bf16.msra.mxu1 %v2252_v42 }
 0x175   :  { %877 = vmatprep.subr.bf16.mxu0 %v2152_v5  ;;  %918 = vmatprep.subr.bf16.mxu1 %v2167_v15 }
 0x217   :  { %v619_v46 = vpop.f32.mrf.mxu0  ;;  %v660_v47 = vpop.f32.mrf.mxu1 }
 0x219   :  { %v621_v48 = vpop.f32.mrf.mxu0  ;;  %v662_v49 = vpop.f32.mrf.mxu1 }
 0x21a   :  { %v671_v50 = vcombine.low %v619_v46, %v621_v48  ;;  %v672_v51 = vcombine.low %v660_v47, %v662_v49 }
 0x21b   :  { %v623_v52 = vpop.f32.mrf.mxu0  ;;  %v664_v53 = vpop.f32.mrf.mxu1 }
 0x21c   :  { %v679_v54 = vrot.slane %v671_v50, %v2296_v10  ;;  %v686_v55 = vrot.slane %v672_v51, %v2296_v10 }
 0x21d   :  { %v624_v44 = vpop.f32.mrf.mxu0  ;;  %v665_v56 = vpop.f32.mrf.mxu1 }
 0x21e   :  { %v687_v57 = vcombine.low %v679_v54, %v686_v55 }
 0x220   :  { %v694_v58 = vrot.slane %v687_v57, %v2296_v10 }
 0x222   :  { %v696_v60 = vadd.f32 %v694_v58, %v583_v59 }
 0x224   :  { %v1735_v61 = vmul.f32 -1.442695, %v696_v60  ;;  %v704_v62 = vrot.slane %v696_v60, 1  ;;  %v715_v2 = vrot.slane %v696_v60, 3  ;;  %v712_v6 = vrot.slane %v696_v60, 2 }
 0x226   :  { %1885 = vpow2.f32 %v1735_v61  ;;  %v1736_v63 = vmul.f32 -1.442695, %v704_v62  ;;  %v1737_v3 = vmul.f32 -1.442695, %v715_v2 }
 0x228   :  { %1887 = vpow2.f32 %v1736_v63 }
 0x229   :  { %1889 = vpow2.f32 %v1737_v3 }
 0x233   :  { %v1886_v4 = vpop.eup %1885 }
 0x234   :  { %v700_v8 = vadd.f32 1.0, %v1886_v4 }
 0x235   :  { %v1888_v11 = vpop.eup %1887 }
 0x236   :  { %1891 = vrcp.f32 %v700_v8  ;;  %v709_v13 = vadd.f32 1.0, %v1888_v11  ;;  %v1890_v43 = vpop.eup %1889  ;;  %v729_v8 = vld [vmem:[#allocation2 + $0x2] ss:$8 sm:$0xf] }
 0x237   :  { %1893 = vtanh.f32 %v712_v6  ;;  %v720_v48 = vadd.f32 1.0, %v1890_v43 }
 0x238   :  { %1895 = vrcp.f32 %v709_v13 }
 0x239   :  { %1897 = vrcp.f32 %v720_v48 }
 0x243   :  { %v1892_v45 = vpop.eup %1891 }
 0x244   :  { %v1894_v46 = vpop.eup %1893 }
 0x245   :  { %v1896_v47 = vpop.eup %1895  ;;  %v724_v50 = vmul.f32 %v1894_v46, %v1892_v45 }
 0x246   :  { %v723_v49 = vmul.f32 %v1896_v47, %v2301_v9  ;;  %v1898_v52 = vpop.eup %1897 }
 0x248   :  { %v2342_v51 = vadd.f32 %v724_v50, %v723_v49 }
 0x24a   :  { %1899 = vtanh.f32 %v2342_v51 }
 0x257   :  { %v1900_v53 = vpop.eup %1899 }
 0x258   :  { %v727_v54 = vmul.f32 %v1900_v53, %v1898_v52 }
 0x25a   :  { %v730_v55 = vpack.c.bf16 %v727_v54, %v727_v54 }
 0x25c   :  { %764 = vmatmul.mubr.bf16.vlgmr.msra.gmra.mxu0 %v730_v55  ;;  %805 = vmatmul.mubr.bf16.vlgmr.msra.gmra.mxu1 %v730_v55 }
 0x25d   :  { %878 = vmatpush1.bf16.msra.mxu0 %v2154_v7  ;;  %919 = vmatpush1.bf16.msra.mxu1 %v2169_v16 }
 0x25e   :  { %879 = vmatprep.subr.bf16.mxu0 %v2161_v12  ;;  %920 = vmatprep.subr.bf16.mxu1 %v2179_v19 }
 0x25f   :  { %909 = vmatprep.mubr.bf16.mxu0 %v2103_v1  ;;  %950 = vmatprep.mubr.bf16.mxu1 %v2103_v1 }
 0x261   :  { %880 = vmatpush1.bf16.msra.mxu0 %v2164_v14  ;;  %921 = vmatpush1.bf16.msra.mxu1 %v2183_v20 }
 0x262   :  { %881 = vmatprep.subr.bf16.mxu0 %v2172_v17  ;;  %922 = vmatprep.subr.bf16.mxu1 %v2188_v22 }
 0x265   :  { %882 = vmatpush1.bf16.msra.mxu0 %v2175_v18  ;;  %923 = vmatpush1.bf16.msra.mxu1 %v2198_v25 }
 0x266   :  { %883 = vmatprep.subr.bf16.mxu0 %v2185_v21  ;;  %924 = vmatprep.subr.bf16.mxu1 %v2201_v26 }
 0x269   :  { %884 = vmatpush1.bf16.msra.mxu0 %v2192_v23  ;;  %925 = vmatpush1.bf16.msra.mxu1 %v2210_v29 }
 0x26a   :  { %885 = vmatprep.subr.bf16.mxu0 %v2195_v24  ;;  %926 = vmatprep.subr.bf16.mxu1 %v2213_v30 }
 0x26d   :  { %886 = vmatpush1.bf16.msra.mxu0 %v2204_v27  ;;  %927 = vmatpush1.bf16.msra.mxu1 %v2222_v33 }
 0x26e   :  { %887 = vmatprep.subr.bf16.mxu0 %v2207_v28  ;;  %928 = vmatprep.subr.bf16.mxu1 %v2225_v34 }
 0x271   :  { %888 = vmatpush1.bf16.msra.mxu0 %v2216_v31  ;;  %929 = vmatpush1.bf16.msra.mxu1 %v2234_v37 }
 0x272   :  { %889 = vmatprep.subr.bf16.mxu0 %v2219_v32  ;;  %930 = vmatprep.subr.bf16.mxu1 %v2237_v38 }
 0x275   :  { %890 = vmatpush1.bf16.msra.mxu0 %v2228_v35  ;;  %931 = vmatpush1.bf16.msra.mxu1 %v2244_v40 }
 0x276   :  { %891 = vmatprep.subr.bf16.mxu0 %v2231_v36  ;;  %932 = vmatprep.subr.bf16.mxu1 %v2247_v41 }
 0x279   :  { %892 = vmatpush1.bf16.msra.mxu0 %v2240_v39  ;;  %933 = vmatpush1.bf16.msra.mxu1 %v2252_v42 }
 0x27a   :  { %1023 = vmatprep.subr.bf16.mxu0 %v2152_v5  ;;  %1064 = vmatprep.subr.bf16.mxu1 %v2167_v15 }
 0x31c   :  { %v765_v9 = vpop.f32.mrf.mxu0  ;;  %v806_v44 = vpop.f32.mrf.mxu1 }
 0x31e   :  { %v767_v56 = vpop.f32.mrf.mxu0  ;;  %v808_v57 = vpop.f32.mrf.mxu1 }
 0x31f   :  { %v817_v58 = vcombine.low %v765_v9, %v767_v56  ;;  %v818_v59 = vcombine.low %v806_v44, %v808_v57 }
 0x320   :  { %v769_v60 = vpop.f32.mrf.mxu0  ;;  %v810_v61 = vpop.f32.mrf.mxu1 }
 0x321   :  { %v825_v62 = vrot.slane %v817_v58, %v2296_v10  ;;  %v832_v63 = vrot.slane %v818_v59, %v2296_v10 }
 0x322   :  { %v770_v2 = vpop.f32.mrf.mxu0  ;;  %v811_v3 = vpop.f32.mrf.mxu1 }
 0x323   :  { %v833_v4 = vcombine.low %v825_v62, %v832_v63 }
 0x325   :  { %v840_v6 = vrot.slane %v833_v4, %v2296_v10 }
 0x327   :  { %v842_v11 = vadd.f32 %v840_v6, %v729_v8 }
 0x329   :  { %v1738_v13 = vmul.f32 -1.442695, %v842_v11  ;;  %v850_v43 = vrot.slane %v842_v11, 1  ;;  %v861_v46 = vrot.slane %v842_v11, 3  ;;  %v858_v49 = vrot.slane %v842_v11, 2 }
 0x32b   :  { %1901 = vpow2.f32 %v1738_v13  ;;  %v1739_v45 = vmul.f32 -1.442695, %v850_v43  ;;  %v1740_v47 = vmul.f32 -1.442695, %v861_v46 }
 0x32d   :  { %1903 = vpow2.f32 %v1739_v45 }
 0x32e   :  { %1905 = vpow2.f32 %v1740_v47 }
 0x338   :  { %v1902_v48 = vpop.eup %1901 }
 0x339   :  { %v846_v50 = vadd.f32 1.0, %v1902_v48 }
 0x33a   :  { %v1904_v52 = vpop.eup %1903 }
 0x33b   :  { %1907 = vrcp.f32 %v846_v50  ;;  %v855_v53 = vadd.f32 1.0, %v1904_v52  ;;  %v1906_v54 = vpop.eup %1905  ;;  %v875_v50 = vld [vmem:[#allocation2 + $0x3] ss:$8 sm:$0xf] }
 0x33c   :  { %1909 = vtanh.f32 %v858_v49  ;;  %v866_v56 = vadd.f32 1.0, %v1906_v54 }
 0x33d   :  { %1911 = vrcp.f32 %v855_v53 }
 0x33e   :  { %1913 = vrcp.f32 %v866_v56 }
 0x348   :  { %v1908_v55 = vpop.eup %1907 }
 0x349   :  { %v1910_v9 = vpop.eup %1909 }
 0x34a   :  { %v1912_v44 = vpop.eup %1911  ;;  %v870_v58 = vmul.f32 %v1910_v9, %v1908_v55 }
 0x34b   :  { %v869_v57 = vmul.f32 %v1912_v44, %v2342_v51  ;;  %v1914_v60 = vpop.eup %1913 }
 0x34d   :  { %v2383_v59 = vadd.f32 %v870_v58, %v869_v57 }
 0x34f   :  { %1915 = vtanh.f32 %v2383_v59 }
 0x35c   :  { %v1916_v61 = vpop.eup %1915 }
 0x35d   :  { %v873_v62 = vmul.f32 %v1916_v61, %v1914_v60 }
 0x35f   :  { %v876_v63 = vpack.c.bf16 %v873_v62, %v873_v62 }
 0x361   :  { %910 = vmatmul.mubr.bf16.vlgmr.msra.gmra.mxu0 %v876_v63  ;;  %951 = vmatmul.mubr.bf16.vlgmr.msra.gmra.mxu1 %v876_v63 }
 0x362   :  { %1024 = vmatpush1.bf16.msra.mxu0 %v2154_v7  ;;  %1065 = vmatpush1.bf16.msra.mxu1 %v2169_v16 }
 0x363   :  { %1025 = vmatprep.subr.bf16.mxu0 %v2161_v12  ;;  %1066 = vmatprep.subr.bf16.mxu1 %v2179_v19 }
 0x364   :  { %1055 = vmatprep.mubr.bf16.mxu0 %v2103_v1  ;;  %1096 = vmatprep.mubr.bf16.mxu1 %v2103_v1 }
 0x366   :  { %1026 = vmatpush1.bf16.msra.mxu0 %v2164_v14  ;;  %1067 = vmatpush1.bf16.msra.mxu1 %v2183_v20 }
 0x367   :  { %1027 = vmatprep.subr.bf16.mxu0 %v2172_v17  ;;  %1068 = vmatprep.subr.bf16.mxu1 %v2188_v22 }
 0x36a   :  { %1028 = vmatpush1.bf16.msra.mxu0 %v2175_v18  ;;  %1069 = vmatpush1.bf16.msra.mxu1 %v2198_v25 }
 0x36b   :  { %1029 = vmatprep.subr.bf16.mxu0 %v2185_v21  ;;  %1070 = vmatprep.subr.bf16.mxu1 %v2201_v26 }
 0x36e   :  { %1030 = vmatpush1.bf16.msra.mxu0 %v2192_v23  ;;  %1071 = vmatpush1.bf16.msra.mxu1 %v2210_v29 }
 0x36f   :  { %1031 = vmatprep.subr.bf16.mxu0 %v2195_v24  ;;  %1072 = vmatprep.subr.bf16.mxu1 %v2213_v30 }
 0x372   :  { %1032 = vmatpush1.bf16.msra.mxu0 %v2204_v27  ;;  %1073 = vmatpush1.bf16.msra.mxu1 %v2222_v33 }
 0x373   :  { %1033 = vmatprep.subr.bf16.mxu0 %v2207_v28  ;;  %1074 = vmatprep.subr.bf16.mxu1 %v2225_v34 }
 0x376   :  { %1034 = vmatpush1.bf16.msra.mxu0 %v2216_v31  ;;  %1075 = vmatpush1.bf16.msra.mxu1 %v2234_v37 }
 0x377   :  { %1035 = vmatprep.subr.bf16.mxu0 %v2219_v32  ;;  %1076 = vmatprep.subr.bf16.mxu1 %v2237_v38 }
 0x37a   :  { %1036 = vmatpush1.bf16.msra.mxu0 %v2228_v35  ;;  %1077 = vmatpush1.bf16.msra.mxu1 %v2244_v40 }
 0x37b   :  { %1037 = vmatprep.subr.bf16.mxu0 %v2231_v36  ;;  %1078 = vmatprep.subr.bf16.mxu1 %v2247_v41 }
 0x37e   :  { %1038 = vmatpush1.bf16.msra.mxu0 %v2240_v39  ;;  %1079 = vmatpush1.bf16.msra.mxu1 %v2252_v42 }
 0x37f   :  { %1169 = vmatprep.subr.bf16.mxu0 %v2152_v5  ;;  %1210 = vmatprep.subr.bf16.mxu1 %v2167_v15 }
 0x421   :  { %v911_v51 = vpop.f32.mrf.mxu0  ;;  %v952_v2 = vpop.f32.mrf.mxu1 }
 0x423   :  { %v913_v3 = vpop.f32.mrf.mxu0  ;;  %v954_v4 = vpop.f32.mrf.mxu1 }
 0x424   :  { %v963_v6 = vcombine.low %v911_v51, %v913_v3  ;;  %v964_v8 = vcombine.low %v952_v2, %v954_v4 }
 0x425   :  { %v915_v11 = vpop.f32.mrf.mxu0  ;;  %v956_v13 = vpop.f32.mrf.mxu1 }
 0x426   :  { %v971_v43 = vrot.slane %v963_v6, %v2296_v10  ;;  %v978_v45 = vrot.slane %v964_v8, %v2296_v10 }
 0x427   :  { %v916_v46 = vpop.f32.mrf.mxu0  ;;  %v957_v47 = vpop.f32.mrf.mxu1 }
 0x428   :  { %v979_v48 = vcombine.low %v971_v43, %v978_v45 }
 0x42a   :  { %v986_v49 = vrot.slane %v979_v48, %v2296_v10 }
 0x42c   :  { %v988_v52 = vadd.f32 %v986_v49, %v875_v50 }
 0x42e   :  { %v1741_v53 = vmul.f32 -1.442695, %v988_v52  ;;  %v996_v54 = vrot.slane %v988_v52, 1  ;;  %v1007_v9 = vrot.slane %v988_v52, 3  ;;  %v1004_v57 = vrot.slane %v988_v52, 2 }
 0x430   :  { %1917 = vpow2.f32 %v1741_v53  ;;  %v1742_v55 = vmul.f32 -1.442695, %v996_v54  ;;  %v1743_v44 = vmul.f32 -1.442695, %v1007_v9 }
 0x432   :  { %1919 = vpow2.f32 %v1742_v55 }
 0x433   :  { %1921 = vpow2.f32 %v1743_v44 }
 0x43d   :  { %v1918_v56 = vpop.eup %1917 }
 0x43e   :  { %v992_v58 = vadd.f32 1.0, %v1918_v56 }
 0x43f   :  { %v1920_v60 = vpop.eup %1919 }
 0x440   :  { %1923 = vrcp.f32 %v992_v58  ;;  %v1001_v61 = vadd.f32 1.0, %v1920_v60  ;;  %v1922_v62 = vpop.eup %1921 }
 0x441   :  { %1925 = vtanh.f32 %v1004_v57  ;;  %v1012_v3 = vadd.f32 1.0, %v1922_v62 }
 0x442   :  { %1927 = vrcp.f32 %v1001_v61 }
 0x443   :  { %1929 = vrcp.f32 %v1012_v3 }
 0x44d   :  { %v1924_v63 = vpop.eup %1923 }
 0x44e   :  { %v1926_v51 = vpop.eup %1925 }
 0x44f   :  { %v1928_v2 = vpop.eup %1927  ;;  %v1016_v6 = vmul.f32 %v1926_v51, %v1924_v63 }
 0x450   :  { %v1015_v4 = vmul.f32 %v1928_v2, %v2383_v59  ;;  %v1930_v11 = vpop.eup %1929 }
 0x452   :  { %v2424_v8 = vadd.f32 %v1016_v6, %v1015_v4 }
 0x454   :  { %1931 = vtanh.f32 %v2424_v8 }
 0x461   :  { %v1932_v13 = vpop.eup %1931 }
 0x462   :  { %v1019_v43 = vmul.f32 %v1932_v13, %v1930_v11  ;;  %v2468_v11 = vld [vmem:[#allocation5 + $0xe0] ss:$16 sps:$4 sm:$0xff]   ;;  %v2471_v13 = vld [vmem:[#allocation5 + $0xe8] ss:$16 sps:$4 sm:$0xff]  }
 0x464   :  { %v1022_v45 = vpack.c.bf16 %v1019_v43, %v1019_v43  ;;  %v2477_v43 = vld [vmem:[#allocation5 + $0xcc] ss:$16 sps:$4 sm:$0xff]  }
 0x466   :  { %1056 = vmatmul.mubr.bf16.vlgmr.msra.gmra.mxu0 %v1022_v45  ;;  %1097 = vmatmul.mubr.bf16.vlgmr.msra.gmra.mxu1 %v1022_v45  ;;  %v2482_v45 = vld [vmem:[#allocation5 + $0xc0] ss:$16 sps:$4 sm:$0xff]  }
 0x467   :  { %1170 = vmatpush1.bf16.msra.mxu0 %v2154_v7  ;;  %1211 = vmatpush1.bf16.msra.mxu1 %v2169_v16 }
 0x468   :  { %1171 = vmatprep.subr.bf16.mxu0 %v2161_v12  ;;  %1212 = vmatprep.subr.bf16.mxu1 %v2179_v19 }
 0x469   :  { %1201 = vmatprep.mubr.bf16.mxu0 %v2103_v1  ;;  %1242 = vmatprep.mubr.bf16.mxu1 %v2103_v1 }
 0x46b   :  { %1172 = vmatpush1.bf16.msra.mxu0 %v2164_v14  ;;  %1213 = vmatpush1.bf16.msra.mxu1 %v2183_v20 }
 0x46c   :  { %1173 = vmatprep.subr.bf16.mxu0 %v2172_v17  ;;  %1214 = vmatprep.subr.bf16.mxu1 %v2188_v22 }
 0x46f   :  { %1174 = vmatpush1.bf16.msra.mxu0 %v2175_v18  ;;  %1215 = vmatpush1.bf16.msra.mxu1 %v2198_v25 }
 0x470   :  { %1175 = vmatprep.subr.bf16.mxu0 %v2185_v21  ;;  %1216 = vmatprep.subr.bf16.mxu1 %v2201_v26 }
 0x473   :  { %1176 = vmatpush1.bf16.msra.mxu0 %v2192_v23  ;;  %1217 = vmatpush1.bf16.msra.mxu1 %v2210_v29 }
 0x474   :  { %1177 = vmatprep.subr.bf16.mxu0 %v2195_v24  ;;  %1218 = vmatprep.subr.bf16.mxu1 %v2213_v30 }
 0x477   :  { %1178 = vmatpush1.bf16.msra.mxu0 %v2204_v27  ;;  %1219 = vmatpush1.bf16.msra.mxu1 %v2222_v33 }
 0x478   :  { %1179 = vmatprep.subr.bf16.mxu0 %v2207_v28  ;;  %1220 = vmatprep.subr.bf16.mxu1 %v2225_v34 }
 0x47b   :  { %1180 = vmatpush1.bf16.msra.mxu0 %v2216_v31  ;;  %1221 = vmatpush1.bf16.msra.mxu1 %v2234_v37 }
 0x47c   :  { %1181 = vmatprep.subr.bf16.mxu0 %v2219_v32  ;;  %1222 = vmatprep.subr.bf16.mxu1 %v2237_v38 }
 0x47f   :  { %1182 = vmatpush1.bf16.msra.mxu0 %v2228_v35  ;;  %1223 = vmatpush1.bf16.msra.mxu1 %v2244_v40 }
 0x480   :  { %1183 = vmatprep.subr.bf16.mxu0 %v2231_v36  ;;  %1224 = vmatprep.subr.bf16.mxu1 %v2247_v41 }
 0x483   :  { %1184 = vmatpush1.bf16.msra.mxu0 %v2240_v39  ;;  %1225 = vmatpush1.bf16.msra.mxu1 %v2252_v42 }
 0x484   :  { %1315 = vmatprep.subr.bf16.mxu0 %v2152_v5  ;;  %1356 = vmatprep.subr.bf16.mxu1 %v2167_v15  ;;  %v1021_v5 = vld [vmem:[#allocation2 + $0x4] ss:$8 sm:$0xf] }
 0x526   :  { %v1057_v7 = vpop.f32.mrf.mxu0  ;;  %v1098_v12 = vpop.f32.mrf.mxu1 }
 0x528   :  { %v1059_v14 = vpop.f32.mrf.mxu0  ;;  %v1100_v16 = vpop.f32.mrf.mxu1 }
 0x529   :  { %v1109_v17 = vcombine.low %v1057_v7, %v1059_v14  ;;  %v1110_v18 = vcombine.low %v1098_v12, %v1100_v16  ;;  %v2485_v7 = vld [vmem:[#allocation5 + $0xc8] ss:$16 sps:$4 sm:$0xff]   ;;  %v2488_v12 = vld [vmem:[#allocation5 + $0xa4] ss:$16 sps:$4 sm:$0xff]   ;;  %v2491_v14 = vld [vmem:[#allocation5 + $0xac] ss:$16 sps:$4 sm:$0xff]  }
 0x52a   :  { %v1061_v19 = vpop.f32.mrf.mxu0  ;;  %v1102_v20 = vpop.f32.mrf.mxu1  ;;  %v2494_v16 = vld [vmem:[#allocation5 + $0xa0] ss:$16 sps:$4 sm:$0xff]  }
 0x52b   :  { %v1117_v21 = vrot.slane %v1109_v17, %v2296_v10  ;;  %v1124_v22 = vrot.slane %v1110_v18, %v2296_v10  ;;  %v2498_v17 = vld [vmem:[#allocation5 + $0x84] ss:$16 sps:$4 sm:$0xff]   ;;  %v2502_v18 = vld [vmem:[#allocation5 + $0x80] ss:$16 sps:$4 sm:$0xff]  }
 0x52c   :  { %v1062_v23 = vpop.f32.mrf.mxu0  ;;  %v1103_v24 = vpop.f32.mrf.mxu1  ;;  %v2506_v19 = vld [vmem:[#allocation5 + $0x64] ss:$16 sps:$4 sm:$0xff]  }
 0x52d   :  { %v1125_v59 = vcombine.low %v1117_v21, %v1124_v22 }
 0x52f   :  { %v1132_v46 = vrot.slane %v1125_v59, %v2296_v10 }
 0x531   :  { %v1134_v47 = vadd.f32 %v1132_v46, %v1021_v5 }
 0x533   :  { %v1744_v15 = vmul.f32 -1.442695, %v1134_v47  ;;  %v1142_v48 = vrot.slane %v1134_v47, 1  ;;  %v1153_v50 = vrot.slane %v1134_v47, 3  ;;  %v1150_v54 = vrot.slane %v1134_v47, 2 }
 0x535   :  { %1933 = vpow2.f32 %v1744_v15  ;;  %v1745_v49 = vmul.f32 -1.442695, %v1142_v48  ;;  %v1746_v52 = vmul.f32 -1.442695, %v1153_v50 }
 0x537   :  { %1935 = vpow2.f32 %v1745_v49 }
 0x538   :  { %1937 = vpow2.f32 %v1746_v52 }
 0x542   :  { %v1934_v53 = vpop.eup %1933 }
 0x543   :  { %v1138_v55 = vadd.f32 1.0, %v1934_v53 }
 0x544   :  { %v1936_v9 = vpop.eup %1935 }
 0x545   :  { %1939 = vrcp.f32 %v1138_v55  ;;  %v1147_v44 = vadd.f32 1.0, %v1936_v9  ;;  %v1938_v56 = vpop.eup %1937 }
 0x546   :  { %1941 = vtanh.f32 %v1150_v54  ;;  %v1158_v61 = vadd.f32 1.0, %v1938_v56 }
 0x547   :  { %1943 = vrcp.f32 %v1147_v44 }
 0x548   :  { %1945 = vrcp.f32 %v1158_v61  ;;  %v2012_v61 = vld [vmem:[#allocation5 + $0x8c] ss:$16 sps:$4 sm:$0xff]  }
 0x552   :  { %v1940_v57 = vpop.eup %1939 }
 0x553   :  { %v1942_v58 = vpop.eup %1941 }
 0x554   :  { %v1944_v60 = vpop.eup %1943  ;;  %v1162_v63 = vmul.f32 %v1942_v58, %v1940_v57 }
 0x555   :  { %v1161_v62 = vmul.f32 %v1944_v60, %v2424_v8  ;;  %v1946_v2 = vpop.eup %1945  ;;  %v2474_v8 = vld [vmem:[#allocation5 + $0xc4] ss:$16 sps:$4 sm:$0xff]   ;;  %v2011_v60 = vld [vmem:[#allocation5 + $0xa8] ss:$16 sps:$4 sm:$0xff]  }
 0x557   :  { %v2465_v51 = vadd.f32 %v1162_v63, %v1161_v62  ;;  %v2013_v62 = vld [vmem:[#allocation5 + $0x88] ss:$16 sps:$4 sm:$0xff]   ;;  %v2015_v63 = vld [vmem:[#allocation5 + $0x60] ss:$16 sps:$4 sm:$0xff]  }
 0x559   :  { %1947 = vtanh.f32 %v2465_v51 }
 0x566   :  { %v1948_v3 = vpop.eup %1947 }
 0x567   :  { %v1165_v4 = vmul.f32 %v1948_v3, %v1946_v2  ;;  %v2017_v2 = vld [vmem:[#allocation5 + $0x44] ss:$16 sps:$4 sm:$0xff]   ;;  %v2018_v3 = vld [vmem:[#allocation5 + $0x4c] ss:$16 sps:$4 sm:$0xff]  }
 0x569   :  { %v1168_v6 = vpack.c.bf16 %v1165_v4, %v1165_v4  ;;  %v2019_v4 = vld [vmem:[#allocation5 + $0x40] ss:$16 sps:$4 sm:$0xff]  }
 0x56b   :  { %1202 = vmatmul.mubr.bf16.vlgmr.msra.gmra.mxu0 %v1168_v6  ;;  %1243 = vmatmul.mubr.bf16.vlgmr.msra.gmra.mxu1 %v1168_v6  ;;  %v2020_v6 = vld [vmem:[#allocation5 + $0x48] ss:$16 sps:$4 sm:$0xff]  }
 0x56c   :  { %1316 = vmatpush1.bf16.msra.mxu0 %v2468_v11  ;;  %1357 = vmatpush1.bf16.msra.mxu1 %v2471_v13 }
 0x56d   :  { %1317 = vmatprep.subr.bf16.mxu0 %v2474_v8  ;;  %1358 = vmatprep.subr.bf16.mxu1 %v2477_v43 }
 0x56e   :  { %1347 = vmatprep.mubr.bf16.mxu0 %v2103_v1  ;;  %1388 = vmatprep.mubr.bf16.mxu1 %v2103_v1 }
 0x570   :  { %1318 = vmatpush1.bf16.msra.mxu0 %v2482_v45  ;;  %1359 = vmatpush1.bf16.msra.mxu1 %v2485_v7 }
 0x571   :  { %1319 = vmatprep.subr.bf16.mxu0 %v2488_v12  ;;  %1360 = vmatprep.subr.bf16.mxu1 %v2491_v14 }
 0x574   :  { %1320 = vmatpush1.bf16.msra.mxu0 %v2494_v16  ;;  %1361 = vmatpush1.bf16.msra.mxu1 %v2198_v25  ;;  %v2009_v25 = vld [vmem:[#allocation5 + $0xe4] ss:$16 sps:$4 sm:$0xff]  }
 0x575   :  { %1321 = vmatprep.subr.bf16.mxu0 %v2498_v17  ;;  %1362 = vmatprep.subr.bf16.mxu1 %v2201_v26  ;;  %v2010_v26 = vld [vmem:[#allocation5 + $0xec] ss:$16 sps:$4 sm:$0xff]  }
 0x578   :  { %1322 = vmatpush1.bf16.msra.mxu0 %v2502_v18  ;;  %1363 = vmatpush1.bf16.msra.mxu1 %v2210_v29 }
 0x579   :  { %1323 = vmatprep.subr.bf16.mxu0 %v2506_v19  ;;  %1364 = vmatprep.subr.bf16.mxu1 %v2213_v30 }
 0x57c   :  { %1324 = vmatpush1.bf16.msra.mxu0 %v2204_v27  ;;  %1365 = vmatpush1.bf16.msra.mxu1 %v2222_v33 }
 0x57d   :  { %1325 = vmatprep.subr.bf16.mxu0 %v2207_v28  ;;  %1366 = vmatprep.subr.bf16.mxu1 %v2225_v34 }
 0x580   :  { %1326 = vmatpush1.bf16.msra.mxu0 %v2216_v31  ;;  %1367 = vmatpush1.bf16.msra.mxu1 %v2234_v37 }
 0x581   :  { %1327 = vmatprep.subr.bf16.mxu0 %v2219_v32  ;;  %1368 = vmatprep.subr.bf16.mxu1 %v2237_v38 }
 0x584   :  { %1328 = vmatpush1.bf16.msra.mxu0 %v2228_v35  ;;  %1369 = vmatpush1.bf16.msra.mxu1 %v2244_v40 }
 0x585   :  { %1329 = vmatprep.subr.bf16.mxu0 %v2231_v36  ;;  %1370 = vmatprep.subr.bf16.mxu1 %v2247_v41  ;;  %v1167_v41 = vld [vmem:[#allocation2 + $0x5] ss:$8 sm:$0xf] }
 0x588   :  { %1330 = vmatpush1.bf16.msra.mxu0 %v2240_v39  ;;  %1371 = vmatpush1.bf16.msra.mxu1 %v2252_v42 }
 0x589   :  { %1461 = vmatprep.subr.bf16.mxu0 %v2009_v25  ;;  %1502 = vmatprep.subr.bf16.mxu1 %v2010_v26 }
 0x62b   :  { %v1203_v27 = vpop.f32.mrf.mxu0  ;;  %v1244_v28 = vpop.f32.mrf.mxu1 }
 0x62d   :  { %v1205_v29 = vpop.f32.mrf.mxu0  ;;  %v1246_v30 = vpop.f32.mrf.mxu1 }
 0x62e   :  { %v1255_v31 = vcombine.low %v1203_v27, %v1205_v29  ;;  %v1256_v32 = vcombine.low %v1244_v28, %v1246_v30 }
 0x62f   :  { %v1207_v33 = vpop.f32.mrf.mxu0  ;;  %v1248_v34 = vpop.f32.mrf.mxu1 }
 0x630   :  { %v1263_v35 = vrot.slane %v1255_v31, %v2296_v10  ;;  %v1270_v36 = vrot.slane %v1256_v32, %v2296_v10 }
 0x631   :  { %v1208_v37 = vpop.f32.mrf.mxu0  ;;  %v1249_v38 = vpop.f32.mrf.mxu1 }
 0x632   :  { %v1271_v39 = vcombine.low %v1263_v35, %v1270_v36  ;;  %v1313_v35 = vld [vmem:[#allocation2 + $0x6] ss:$8 sm:$0xf] }
 0x634   :  { %v1278_v40 = vrot.slane %v1271_v39, %v2296_v10 }
 0x636   :  { %v1280_v42 = vadd.f32 %v1278_v40, %v1167_v41 }
 0x638   :  { %v1747_v20 = vmul.f32 -1.442695, %v1280_v42  ;;  %v1288_v21 = vrot.slane %v1280_v42, 1  ;;  %v1299_v23 = vrot.slane %v1280_v42, 3  ;;  %v1296_v46 = vrot.slane %v1280_v42, 2 }
 0x63a   :  { %1949 = vpow2.f32 %v1747_v20  ;;  %v1748_v22 = vmul.f32 -1.442695, %v1288_v21  ;;  %v1749_v24 = vmul.f32 -1.442695, %v1299_v23 }
 0x63c   :  { %1951 = vpow2.f32 %v1748_v22 }
 0x63d   :  { %1953 = vpow2.f32 %v1749_v24 }
 0x647   :  { %v1950_v59 = vpop.eup %1949 }
 0x648   :  { %v1284_v5 = vadd.f32 1.0, %v1950_v59 }
 0x649   :  { %v1952_v47 = vpop.eup %1951 }
 0x64a   :  { %1955 = vrcp.f32 %v1284_v5  ;;  %v1293_v15 = vadd.f32 1.0, %v1952_v47  ;;  %v1954_v48 = vpop.eup %1953 }
 0x64b   :  { %1957 = vtanh.f32 %v1296_v46  ;;  %v1304_v53 = vadd.f32 1.0, %v1954_v48 }
 0x64c   :  { %1959 = vrcp.f32 %v1293_v15 }
 0x64d   :  { %1961 = vrcp.f32 %v1304_v53 }
 0x657   :  { %v1956_v49 = vpop.eup %1955 }
 0x658   :  { %v1958_v50 = vpop.eup %1957 }
 0x659   :  { %v1960_v52 = vpop.eup %1959  ;;  %v1308_v55 = vmul.f32 %v1958_v50, %v1956_v49 }
 0x65a   :  { %v1307_v54 = vmul.f32 %v1960_v52, %v2465_v51  ;;  %v1962_v44 = vpop.eup %1961  ;;  %v2016_v51 = vld [vmem:[#allocation5 + $0x68] ss:$16 sps:$4 sm:$0xff]  }
 0x65c   :  { %v2528_v9 = vadd.f32 %v1308_v55, %v1307_v54  ;;  %v1619_v55 = vld [vmem:[#allocation7 + $0x78] sm:$0xff] }
 0x65e   :  { %1963 = vtanh.f32 %v2528_v9 }
 0x66b   :  { %v1964_v56 = vpop.eup %1963 }
 0x66c   :  { %v1311_v57 = vmul.f32 %v1964_v56, %v1962_v44  ;;  %v1618_v44 = vld [vmem:[#allocation7 + $0x70] sm:$0xff]  ;;  %v1616_v56 = vld [vmem:[#allocation7 + $0x60] sm:$0xff] }
 0x66e   :  { %v1314_v58 = vpack.c.bf16 %v1311_v57, %v1311_v57  ;;  %v1615_v57 = vld [vmem:[#allocation7 + $0x58] sm:$0xff] }
 0x670   :  { %1348 = vmatmul.mubr.bf16.vlgmr.msra.gmra.mxu0 %v1314_v58  ;;  %1389 = vmatmul.mubr.bf16.vlgmr.msra.gmra.mxu1 %v1314_v58  ;;  %v1614_v58 = vld [vmem:[#allocation7 + $0x50] sm:$0xff] }
 0x671   :  { %1462 = vmatpush1.bf16.msra.mxu0 %v2468_v11  ;;  %1503 = vmatpush1.bf16.msra.mxu1 %v2471_v13  ;;  %v2021_v11 = vld [vmem:[#allocation5 + $0x24] ss:$16 sps:$4 sm:$0xff]   ;;  %v2022_v13 = vld [vmem:[#allocation5 + $0x2c] ss:$16 sps:$4 sm:$0xff]  }
 0x672   :  { %1463 = vmatprep.subr.bf16.mxu0 %v2474_v8  ;;  %1504 = vmatprep.subr.bf16.mxu1 %v2477_v43  ;;  %v2023_v8 = vld [vmem:[#allocation5 + $0x20] ss:$16 sps:$4 sm:$0xff]   ;;  %v2024_v43 = vld [vmem:[#allocation5 + $0x28] ss:$16 sps:$4 sm:$0xff]  }
 0x673   :  { %1493 = vmatprep.mubr.bf16.mxu0 %v2103_v1  ;;  %1534 = vmatprep.mubr.bf16.mxu1 %v2103_v1  ;;  %v2014_v1 = vld [vmem:[#allocation5 + $0x6c] ss:$16 sps:$4 sm:$0xff]  }
 0x675   :  { %1464 = vmatpush1.bf16.msra.mxu0 %v2482_v45  ;;  %1505 = vmatpush1.bf16.msra.mxu1 %v2485_v7  ;;  %v2025_v45 = vld [vmem:[#allocation5 + $0x4] ss:$16 sps:$4 sm:$0xff]   ;;  %v2026_v7 = vld [vmem:[#allocation5 + $0xc] ss:$16 sps:$4 sm:$0xff]  }
 0x676   :  { %1465 = vmatprep.subr.bf16.mxu0 %v2488_v12  ;;  %1506 = vmatprep.subr.bf16.mxu1 %v2491_v14  ;;  %v2027_v12 = vld [vmem:[#allocation5] ss:$16 sps:$4 sm:$0xff]   ;;  %v2028_v14 = vld [vmem:[#allocation5 + $0x8] ss:$16 sps:$4 sm:$0xff]  }
 0x679   :  { %1466 = vmatpush1.bf16.msra.mxu0 %v2494_v16  ;;  %1507 = vmatpush1.bf16.msra.mxu1 %v2011_v60  ;;  %v1613_v60 = vld [vmem:[#allocation7 + $0x48] sm:$0xff] }
 0x67a   :  { %1467 = vmatprep.subr.bf16.mxu0 %v2498_v17  ;;  %1508 = vmatprep.subr.bf16.mxu1 %v2012_v61  ;;  %v1612_v61 = vld [vmem:[#allocation7 + $0x40] sm:$0xff] }
 0x67d   :  { %1468 = vmatpush1.bf16.msra.mxu0 %v2502_v18  ;;  %1509 = vmatpush1.bf16.msra.mxu1 %v2013_v62  ;;  %v1611_v62 = vld [vmem:[#allocation7 + $0x38] sm:$0xff] }
 0x67e   :  { %1469 = vmatprep.subr.bf16.mxu0 %v2506_v19  ;;  %1510 = vmatprep.subr.bf16.mxu1 %v2014_v1  ;;  %v1610_v1 = vld [vmem:[#allocation7 + $0x30] sm:$0xff] }
 0x681   :  { %1470 = vmatpush1.bf16.msra.mxu0 %v2015_v63  ;;  %1511 = vmatpush1.bf16.msra.mxu1 %v2016_v51  ;;  %v1609_v63 = vld [vmem:[#allocation7 + $0x28] sm:$0xff]  ;;  %v1608_v51 = vld [vmem:[#allocation7 + $0x20] sm:$0xff] }
 0x682   :  { %1471 = vmatprep.subr.bf16.mxu0 %v2017_v2  ;;  %1512 = vmatprep.subr.bf16.mxu1 %v2018_v3  ;;  %v1607_v2 = vld [vmem:[#allocation7 + $0x18] sm:$0xff]  ;;  %v1606_v3 = vld [vmem:[#allocation7 + $0x10] sm:$0xff] }
 0x685   :  { %1472 = vmatpush1.bf16.msra.mxu0 %v2019_v4  ;;  %1513 = vmatpush1.bf16.msra.mxu1 %v2020_v6  ;;  %v1605_v4 = vld [vmem:[#allocation7 + $0x8] sm:$0xff]  ;;  %v1604_v6 = vld [vmem:[#allocation7] sm:$0xff] }
 0x686   :  { %1473 = vmatprep.subr.bf16.mxu0 %v2021_v11  ;;  %1514 = vmatprep.subr.bf16.mxu1 %v2022_v13 }
 0x689   :  { %1474 = vmatpush1.bf16.msra.mxu0 %v2023_v8  ;;  %1515 = vmatpush1.bf16.msra.mxu1 %v2024_v43 }
 0x68a   :  { %1475 = vmatprep.subr.bf16.mxu0 %v2025_v45  ;;  %1516 = vmatprep.subr.bf16.mxu1 %v2026_v7 }
 0x68d   :  { %1476 = vmatpush1.bf16.msra.mxu0 %v2027_v12  ;;  %1517 = vmatpush1.bf16.msra.mxu1 %v2028_v14 }
 0x68e   :  { %1773 = vmatprep.subr.mxu0 %v2102_v0 }
 0x730   :  { %v1349_v16 = vpop.f32.mrf.mxu0  ;;  %v1390_v17 = vpop.f32.mrf.mxu1 }
 0x732   :  { %v1351_v18 = vpop.f32.mrf.mxu0  ;;  %v1392_v19 = vpop.f32.mrf.mxu1 }
 0x733   :  { %v1401_v25 = vcombine.low %v1349_v16, %v1351_v18  ;;  %v1402_v26 = vcombine.low %v1390_v17, %v1392_v19 }
 0x734   :  { %v1353_v27 = vpop.f32.mrf.mxu0  ;;  %v1394_v28 = vpop.f32.mrf.mxu1 }
 0x735   :  { %v1409_v29 = vrot.slane %v1401_v25, %v2296_v10  ;;  %v1416_v30 = vrot.slane %v1402_v26, %v2296_v10  ;;  %v1459_v27 = vld [vmem:[#allocation2 + $0x7] ss:$8 sm:$0xf] }
 0x736   :  { %v1354_v31 = vpop.f32.mrf.mxu0  ;;  %v1395_v32 = vpop.f32.mrf.mxu1 }
 0x737   :  { %v1417_v33 = vcombine.low %v1409_v29, %v1416_v30 }
 0x739   :  { %v1424_v34 = vrot.slane %v1417_v33, %v2296_v10 }
 0x73b   :  { %v1426_v36 = vadd.f32 %v1424_v34, %v1313_v35 }
 0x73d   :  { %v1750_v37 = vmul.f32 -1.442695, %v1426_v36  ;;  %v1434_v38 = vrot.slane %v1426_v36, 1  ;;  %v1445_v40 = vrot.slane %v1426_v36, 3  ;;  %v1442_v20 = vrot.slane %v1426_v36, 2 }
 0x73f   :  { %1965 = vpow2.f32 %v1750_v37  ;;  %v1751_v39 = vmul.f32 -1.442695, %v1434_v38  ;;  %v1752_v41 = vmul.f32 -1.442695, %v1445_v40 }
 0x741   :  { %1967 = vpow2.f32 %v1751_v39 }
 0x742   :  { %1969 = vpow2.f32 %v1752_v41 }
 0x74c   :  { %v1966_v42 = vpop.eup %1965 }
 0x74d   :  { %v1430_v21 = vadd.f32 1.0, %v1966_v42 }
 0x74e   :  { %v1968_v22 = vpop.eup %1967 }
 0x74f   :  { %1971 = vrcp.f32 %v1430_v21  ;;  %v1439_v23 = vadd.f32 1.0, %v1968_v22  ;;  %v1970_v24 = vpop.eup %1969 }
 0x750   :  { %1973 = vtanh.f32 %v1442_v20  ;;  %v1450_v47 = vadd.f32 1.0, %v1970_v24 }
 0x751   :  { %1975 = vrcp.f32 %v1439_v23 }
 0x752   :  { %1977 = vrcp.f32 %v1450_v47 }
 0x75c   :  { %v1972_v59 = vpop.eup %1971 }
 0x75d   :  { %v1974_v46 = vpop.eup %1973 }
 0x75e   :  { %v1976_v5 = vpop.eup %1975  ;;  %v1454_v48 = vmul.f32 %v1974_v46, %v1972_v59  ;;  %v1620_v59 = vld [vmem:[%s2584_s5] sm:$0x1] }
 0x75f   :  { %v1453_v15 = vmul.f32 %v1976_v5, %v2528_v9  ;;  %v1978_v50 = vpop.eup %1977  ;;  %v1617_v9 = vld [vmem:[#allocation7 + $0x68] sm:$0xff] }
 0x761   :  { %v2550_v49 = vadd.f32 %v1454_v48, %v1453_v15 }
 0x763   :  { %1979 = vtanh.f32 %v2550_v49 }
 0x770   :  { %v1980_v52 = vpop.eup %1979 }
 0x771   :  { %v1457_v53 = vmul.f32 %v1980_v52, %v1978_v50 }
 0x773   :  { %v1460_v54 = vpack.c.bf16 %v1457_v53, %v1457_v53 }
 0x775   :  { %1494 = vmatmul.mubr.bf16.vlgmr.msra.gmra.mxu0 %v1460_v54  ;;  %1535 = vmatmul.mubr.bf16.vlgmr.msra.gmra.mxu1 %v1460_v54 }
 0x776   :  { %1774 = vmatpush3.msra.mxu0 %v1619_v55  ;;  %1805 = vmatprep.mubr.msk.f32.mxu0 %vm2105_vm1, %v2102_v0 }
 0x777   :  { %1775 = vmatprep.subr.mxu0 %v2102_v0 }
 0x778   :  { %1776 = vmatpush3.msra.mxu0 %v1618_v44 }
 0x779   :  { %1777 = vmatprep.subr.mxu0 %v2102_v0 }
 0x77a   :  { %1778 = vmatpush3.msra.mxu0 %v1617_v9 }
 0x77b   :  { %1779 = vmatprep.subr.mxu0 %v2102_v0 }
 0x77c   :  { %1780 = vmatpush3.msra.mxu0 %v1616_v56 }
 0x77d   :  { %1781 = vmatprep.subr.mxu0 %v2102_v0 }
 0x77e   :  { %1782 = vmatpush3.msra.mxu0 %v1615_v57 }
 0x77f   :  { %1783 = vmatprep.subr.mxu0 %v2102_v0 }
 0x780   :  { %1784 = vmatpush3.msra.mxu0 %v1614_v58 }
 0x781   :  { %1785 = vmatprep.subr.mxu0 %v2102_v0 }
 0x782   :  { %1786 = vmatpush3.msra.mxu0 %v1613_v60 }
 0x783   :  { %1787 = vmatprep.subr.mxu0 %v2102_v0 }
 0x784   :  { %1788 = vmatpush3.msra.mxu0 %v1612_v61 }
 0x785   :  { %1789 = vmatprep.subr.mxu0 %v2102_v0 }
 0x786   :  { %1790 = vmatpush3.msra.mxu0 %v1611_v62 }
 0x787   :  { %1791 = vmatprep.subr.mxu0 %v2102_v0 }
 0x788   :  { %1792 = vmatpush3.msra.mxu0 %v1610_v1 }
 0x789   :  { %1793 = vmatprep.subr.mxu0 %v2102_v0 }
 0x78a   :  { %1794 = vmatpush3.msra.mxu0 %v1609_v63 }
 0x78b   :  { %1795 = vmatprep.subr.mxu0 %v2102_v0 }
 0x78c   :  { %1796 = vmatpush3.msra.mxu0 %v1608_v51 }
 0x78d   :  { %1797 = vmatprep.subr.mxu0 %v2102_v0 }
 0x78e   :  { %1798 = vmatpush3.msra.mxu0 %v1607_v2 }
 0x78f   :  { %1799 = vmatprep.subr.mxu0 %v2102_v0 }
 0x790   :  { %1800 = vmatpush3.msra.mxu0 %v1606_v3 }
 0x791   :  { %1801 = vmatprep.subr.mxu0 %v2102_v0 }
 0x792   :  { %1802 = vmatpush3.msra.mxu0 %v1605_v4 }
 0x793   :  { %1803 = vmatprep.subr.mxu0 %v2102_v0 }
 0x794   :  { %1804 = vmatpush3.msra.mxu0 %v1604_v6 }
 0x835   :  { %v1495_v11 = vpop.f32.mrf.mxu0  ;;  %v1536_v13 = vpop.f32.mrf.mxu1 }
 0x837   :  { %v1497_v8 = vpop.f32.mrf.mxu0  ;;  %v1538_v43 = vpop.f32.mrf.mxu1 }
 0x838   :  { %v1547_v45 = vcombine.low %v1495_v11, %v1497_v8  ;;  %v1548_v7 = vcombine.low %v1536_v13, %v1538_v43 }
 0x839   :  { %v1499_v12 = vpop.f32.mrf.mxu0  ;;  %v1540_v14 = vpop.f32.mrf.mxu1 }
 0x83a   :  { %v1555_v16 = vrot.slane %v1547_v45, %v2296_v10  ;;  %v1562_v17 = vrot.slane %v1548_v7, %v2296_v10 }
 0x83b   :  { %v1500_v18 = vpop.f32.mrf.mxu0  ;;  %v1541_v19 = vpop.f32.mrf.mxu1 }
 0x83c   :  { %v1563_v25 = vcombine.low %v1555_v16, %v1562_v17 }
 0x83e   :  { %v1570_v26 = vrot.slane %v1563_v25, %v2296_v10 }
 0x840   :  { %v1572_v0 = vadd.f32 %v1570_v26, %v1459_v27 }
 0x842   :  { %v1753_v28 = vmul.f32 -1.442695, %v1572_v0  ;;  %v1580_v29 = vrot.slane %v1572_v0, 1  ;;  %v1591_v31 = vrot.slane %v1572_v0, 3  ;;  %v1588_v34 = vrot.slane %v1572_v0, 2 }
 0x844   :  { %1981 = vpow2.f32 %v1753_v28  ;;  %v1754_v30 = vmul.f32 -1.442695, %v1580_v29  ;;  %v1755_v32 = vmul.f32 -1.442695, %v1591_v31 }
 0x846   :  { %1983 = vpow2.f32 %v1754_v30 }
 0x847   :  { %1985 = vpow2.f32 %v1755_v32 }
 0x851   :  { %v1982_v33 = vpop.eup %1981 }
 0x852   :  { %v1576_v35 = vadd.f32 1.0, %v1982_v33 }
 0x853   :  { %v1984_v36 = vpop.eup %1983 }
 0x854   :  { %1987 = vrcp.f32 %v1576_v35  ;;  %v1585_v37 = vadd.f32 1.0, %v1984_v36  ;;  %v1986_v38 = vpop.eup %1985 }
 0x855   :  { %1989 = vtanh.f32 %v1588_v34  ;;  %v1596_v41 = vadd.f32 1.0, %v1986_v38 }
 0x856   :  { %1991 = vrcp.f32 %v1585_v37 }
 0x857   :  { %1993 = vrcp.f32 %v1596_v41 }
 0x861   :  { %v1988_v10 = vpop.eup %1987 }
 0x862   :  { %v1990_v39 = vpop.eup %1989 }
 0x863   :  { %v1992_v40 = vpop.eup %1991  ;;  %v1600_v20 = vmul.f32 %v1990_v39, %v1988_v10 }
 0x864   :  { %v1599_v42 = vmul.f32 %v1992_v40, %v2550_v49  ;;  %v1994_v22 = vpop.eup %1993 }
 0x866   :  { %v1601_v21 = vadd.f32 %v1600_v20, %v1599_v42 }
 0x868   :  { %1995 = vtanh.f32 %v1601_v21 }
 0x875   :  { %v1996_v23 = vpop.eup %1995 }
 0x876   :  { %v1603_v24 = vmul.f32 %v1996_v23, %v1994_v22 }
 0x878   :  { %1806 = vmatmul.mubr.f32.vlgmr.msra.gmra.mxu0 %v1603_v24 }
 0x938   :  { %v1687_v46 = vpop.f32.mrf.mxu0 }
 0x939   :  { %v1688_v5 = vadd.f32 %v1687_v46, %v1620_v59 }
 0x93a   :  { %v1807_v47 = vpop.f32.mrf.mxu0 }
 0x93b   :  { %1691 = vst [vmem:[%s2585_s6] sm:$0x1] %v1688_v5 }
 0x93c   :  { %1696 = vsyncpa [#allocation4], 1 }
 0x93d   :  { %1697 = vsyncpa [#allocation6], 1 }

</bundles_post_ra>
